<compile_context>
chip_gen: v7x
topology: tpu7x:2x2x1
jax: 0.10.0
libtpu: 0.0.40
codegen_flags: <defaults>
</compile_context>

<pallas_src>
import jax
import jax.numpy as jnp
from jax.experimental import pallas as pl
from jax.experimental.pallas import tpu as pltpu

FEATURES = 4          # `features` in the module
N, H, W = 2, 16, 16   # small test shapes
SCALE = 2
HO, WO = H * SCALE, W * SCALE


# --------------------------------- kernel -----------------------------------
def ffb_kernel(x0_ref, x1_ref, bands_ref, cbias_ref, mh_ref, wk_ref, obias_ref,
               o_ref):
    x0 = x0_ref[0]                      # (H, L) lane-dense slab, L = fold*W*C
    x1 = x1_ref[0]
    h = x0.shape[0]

    # Row masks zero the wrapped row after a sublane roll (replaces the old
    # shift-matrix matmuls: the shift runs on the XLU, the masking on the VPU).
    row = jax.lax.broadcasted_iota(jnp.int32, x0.shape, 0)
    top = row == 0
    bot = row == h - 1

    def conv3x3(x, k):
        # 3x3 'same' conv on the slab as ONE MXU matmul: pack the three
        # dy-shifted operands along K and contract with the stacked band
        # matrix (3L, L) that carries the dx taps + W zero padding.
        xdn = jnp.where(top, 0.0, pltpu.roll(x, shift=1, axis=0))       # x[i-1]
        xup = jnp.where(bot, 0.0, pltpu.roll(x, shift=h - 1, axis=0))   # x[i+1]
        xcat = jnp.concatenate([xdn, x, xup], axis=-1)                  # (H, 3L)
        y = jnp.dot(xcat, bands_ref[k], preferred_element_type=jnp.float32)
        return y + cbias_ref[k]         # (1, L) bias, tiled per pixel

    def rcu(x, k):                      # ResidualConvUnit_custom (bn=False, ReLU)
        out = jnp.maximum(x, 0.0)
        out = conv3x3(out, k)
        out = jnp.maximum(out, 0.0)
        out = conv3x3(out, k + 1)
        return out + x

    out = x0 + rcu(x1, 0)               # resConfUnit1 + skip add
    out = rcu(out, 2)                   # resConfUnit2

    # Fused 1x1 out_conv + width-upsample (wk = wblk @ kw, premultiplied in the
    # wrapper), then the row-upsample: 2 tail matmuls, cheaper contraction first.
    t = jnp.dot(out, wk_ref[...], preferred_element_type=jnp.float32)   # (H, Lout)
    up = jnp.dot(mh_ref[...], t, preferred_element_type=jnp.float32)    # (HO, Lout)
    o_ref[0] = up + obias_ref[...]      # unmasked, lane-dense stores


# --------------------------------- helpers ----------------------------------
def _interp_matrix(n_in, n_out):
    """align_corners=True bilinear interpolation matrix (n_out, n_in)."""
    if n_out == 1 or n_in == 1:
        # align_corners with a degenerate axis maps every output to input[0]
        return jnp.zeros((n_out, n_in), jnp.float32).at[:, 0].set(1.0)
    i = jnp.arange(n_out, dtype=jnp.float32)
    src = i * (n_in - 1) / (n_out - 1)
    lo = jnp.clip(jnp.floor(src).astype(jnp.int32), 0, n_in - 2)
    frac = src - lo.astype(jnp.float32)
    rows = jnp.arange(n_out)
    m = jnp.zeros((n_out, n_in), jnp.float32)
    m = m.at[rows, lo].add(1.0 - frac)
    m = m.at[rows, lo + 1].add(frac)
    return m


def _conv_band_matrices(wgt, w):
    """HWIO (3,3,Cin,Cout) -> (3, w*Cin, w*Cout) banded slab matrices.

    B_dy[(w'+dx-1)*Cin+ci, w'*Cout+co] = wgt[dy,dx,ci,co]; out-of-range columns
    dropped => implicit zero padding along W."""
    mats = []
    for dy in range(3):
        b = jnp.zeros((w * wgt.shape[2], w * wgt.shape[3]), jnp.float32)
        for dx in range(3):
            b = b + jnp.kron(jnp.eye(w, k=1 - dx, dtype=jnp.float32), wgt[dy, dx])
        mats.append(b)
    return jnp.stack(mats)


def _pick_fold(n):
    """How many batch elements to fold into the lane axis per grid step."""
    kind = ""
    try:
        kind = jax.devices()[0].device_kind.lower()
    except Exception:
        pass
    multi_tc = ("v7" in kind) or ("7x" in kind) or ("v4" in kind)
    if multi_tc and n % 2 == 0:
        return n // 2    # one batch group per TensorCore (grid is 'parallel')
    return n             # single TC: one fully lane-dense grid step


# --------------------------------- wrapper ----------------------------------
def feature_fusion_block_da(x0_nchw, x1_nchw, params, fold=None):
    """Runs the Pallas kernel. Inputs/outputs are NCHW like PyTorch."""
    x0 = jnp.transpose(x0_nchw, (0, 2, 3, 1)).astype(jnp.float32)  # NHWC
    x1 = jnp.transpose(x1_nchw, (0, 2, 3, 1)).astype(jnp.float32)
    n, h, w, c = x0.shape
    c_out = params["wout"].shape[1]
    ho, wo = h * SCALE, w * SCALE

    if fold is None:
        fold = _pick_fold(n)
    assert n % fold == 0
    ng = n // fold                       # grid steps
    wc = w * c
    woco = wo * c_out
    L = fold * wc                        # slab lane width (input side)
    Lout = fold * woco                   # slab lane width (output side)

    def to_slab(x_flat):                 # (n, h, wc) -> (ng, h, fold*wc)
        return (x_flat.reshape(ng, fold, h, wc)
                .transpose(0, 2, 1, 3).reshape(ng, h, L))

    x0s = to_slab(x0.reshape(n, h, wc))
    x1s = to_slab(x1.reshape(n, h, wc))

    eye_f = jnp.eye(fold, dtype=jnp.float32)

    def stacked_band(wgt):
        per = _conv_band_matrices(wgt, w)                          # (3, wc, wc)
        # K layout in the kernel is [shift_down | center | shift_up], each block
        # itself block-diagonal across the folded batch.
        return jnp.concatenate(
            [jnp.kron(eye_f, per[dy]) for dy in range(3)], axis=0)  # (3L, L)

    bands = jnp.stack([
        stacked_band(params["rcu1_w1"]),
        stacked_band(params["rcu1_w2"]),
        stacked_band(params["rcu2_w1"]),
        stacked_band(params["rcu2_w2"]),
    ], axis=0)                                                     # (4, 3L, L)

    def tiled_bias(b, reps):
        return jnp.tile(b.reshape(-1), reps).reshape(1, -1)

    cbias = jnp.stack([
        tiled_bias(params["rcu1_b1"], fold * w),
        tiled_bias(params["rcu1_b2"], fold * w),
        tiled_bias(params["rcu2_b1"], fold * w),
        tiled_bias(params["rcu2_b2"], fold * w),
    ], axis=0)                                                     # (4, 1, L)

    # Fused 1x1 out_conv + width-upsample matrix (premultiplied in the wrapper).
    mh = _interp_matrix(h, ho)                                     # (HO, H)
    mw = _interp_matrix(w, wo)                                     # (WO, W)
    wblk = jnp.kron(jnp.eye(w, dtype=jnp.float32), params["wout"])  # (wc, w*c_out)
    kw = jnp.kron(mw.T, jnp.eye(c_out, dtype=jnp.float32))          # (w*c_out, woco)
    wk = jnp.kron(eye_f, wblk @ kw)                                 # (L, Lout)
    obias = tiled_bias(params["bout"], fold * wo)                   # (1, Lout)

    grid_spec = pltpu.PrefetchScalarGridSpec(
        num_scalar_prefetch=0,
        grid=(ng,),
        in_specs=[
            pl.BlockSpec((1, h, L), lambda i: (i, 0, 0)),       # x0 slab
            pl.BlockSpec((1, h, L), lambda i: (i, 0, 0)),       # x1 slab
            pl.BlockSpec((4, 3 * L, L), lambda i: (0, 0, 0)),   # stacked band mats
            pl.BlockSpec((4, 1, L), lambda i: (0, 0, 0)),       # conv biases
            pl.BlockSpec((ho, h), lambda i: (0, 0)),            # row interp mat
            pl.BlockSpec((L, Lout), lambda i: (0, 0)),          # fused 1x1+W-upsample
            pl.BlockSpec((1, Lout), lambda i: (0, 0)),          # out bias (tiled)
        ],
        out_specs=pl.BlockSpec((1, ho, Lout), lambda i: (i, 0, 0)),
    )

    out_slab = pl.pallas_call(
        ffb_kernel,
        out_shape=jax.ShapeDtypeStruct((ng, ho, Lout), jnp.float32),
        grid_spec=grid_spec,
        compiler_params=pltpu.CompilerParams(
            dimension_semantics=("parallel",)),
    )(x0s, x1s, bands, cbias, mh, wk, obias)

    out_nhwc = (out_slab.reshape(ng, ho, fold, woco)
                .transpose(0, 2, 1, 3).reshape(n, ho, wo, c_out))
    return jnp.transpose(out_nhwc, (0, 3, 1, 2))   # back to NCHW


# ------------------------------ plain-JAX reference -------------------------
def _upsample_align_corners(x_nhwc, ho, wo):
    """Independent (gather-based) bilinear align_corners=True resample."""
    n, h, w, c = x_nhwc.shape
    yi = jnp.arange(ho, dtype=jnp.float32) * (h - 1) / (ho - 1)
    xi = jnp.arange(wo, dtype=jnp.float32) * (w - 1) / (wo - 1)
    y0 = jnp.clip(jnp.floor(yi).astype(jnp.int32), 0, h - 2)
    x0 = jnp.clip(jnp.floor(xi).astype(jnp.int32), 0, w - 2)
    fy = (yi - y0).reshape(1, ho, 1, 1)
    fx = (xi - x0).reshape(1, 1, wo, 1)
    g = x_nhwc[:, y0]                      # (n, ho, w, c)
    gt = g[:, :, x0]                       # (n, ho, wo, c)  top-left
    gr = g[:, :, x0 + 1]                   # top-right
    gb = x_nhwc[:, y0 + 1]
    bl = gb[:, :, x0]
    br = gb[:, :, x0 + 1]
    return (gt * (1 - fy) * (1 - fx) + gr * (1 - fy) * fx
            + bl * fy * (1 - fx) + br * fy * fx)


def _reference(x0_nchw, x1_nchw, params):
    x0 = jnp.transpose(x0_nchw, (0, 2, 3, 1)).astype(jnp.float32)
    x1 = jnp.transpose(x1_nchw, (0, 2, 3, 1)).astype(jnp.float32)
    n, h, w, c = x0.shape

    def conv3x3(x, wgt, b):
        y = jax.lax.conv_general_dilated(
            x, wgt, (1, 1), "SAME",
            dimension_numbers=("NHWC", "HWIO", "NHWC"))
        return y + b.reshape(1, 1, 1, -1)

    def rcu(x, w1, b1, w2, b2):
        o = jax.nn.relu(x)
        o = conv3x3(o, w1, b1)
        o = jax.nn.relu(o)
        o = conv3x3(o, w2, b2)
        return o + x

    out = x0 + rcu(x1, params["rcu1_w1"], params["rcu1_b1"],
                   params["rcu1_w2"], params["rcu1_b2"])
    out = rcu(out, params["rcu2_w1"], params["rcu2_b1"],
              params["rcu2_w2"], params["rcu2_b2"])
    out = _upsample_align_corners(out, h * SCALE, w * SCALE)
    out = jnp.einsum("nijc,cd->nijd", out, params["wout"]) \
        + params["bout"].reshape(1, 1, 1, -1)
    return jnp.transpose(out, (0, 3, 1, 2))


# ----------------------------------- main ------------------------------------
if __name__ == "__main__":
    key = jax.random.PRNGKey(0)
    keys = jax.random.split(key, 16)
    c = FEATURES
    c_out = FEATURES  # expand=False -> out_features == features

    def rnd(k, shape, scale=0.1):
        return jax.random.normal(k, shape, jnp.float32) * scale

    params = {
        "rcu1_w1": rnd(keys[0], (3, 3, c, c)), "rcu1_b1": rnd(keys[1], (1, c)),
        "rcu1_w2": rnd(keys[2], (3, 3, c, c)), "rcu1_b2": rnd(keys[3], (1, c)),
        "rcu2_w1": rnd(keys[4], (3, 3, c, c)), "rcu2_b1": rnd(keys[5], (1, c)),
        "rcu2_w2": rnd(keys[6], (3, 3, c, c)), "rcu2_b2": rnd(keys[7], (1, c)),
        "wout":    rnd(keys[8], (c, c_out)),   "bout":    rnd(keys[9], (1, c_out)),
    }

    x0 = jax.random.normal(keys[10], (N, c, H, W), jnp.float32)  # xs[0], NCHW
    x1 = jax.random.normal(keys[11], (N, c, H, W), jnp.float32)  # xs[1], NCHW

    ref = jax.block_until_ready(_reference(x0, x1, params))

    # Auto (device-dependent) fold choice, plus both explicit layouts so that
    # the batch-folded (grid=1, 128-lane slab) and the batch-parallel
    # (grid=N, 'parallel') paths are both exercised regardless of the chip.
    out = jax.block_until_ready(feature_fusion_block_da(x0, x1, params))
    assert out.shape == (N, c_out, H * SCALE, W * SCALE), out.shape
    assert jnp.allclose(out, ref, atol=1e-4, rtol=1e-4), \
        float(jnp.max(jnp.abs(out - ref)))

    for f in (N, 1):
        o = jax.block_until_ready(
            feature_fusion_block_da(x0, x1, params, fold=f))
        assert jnp.allclose(o, ref, atol=1e-4, rtol=1e-4), \
            (f, float(jnp.max(jnp.abs(o - ref))))

    print("KERNEL_OK")
</pallas_src>

<mosaic_0001>
module attributes {stable_mosaic.version = 11 : i64} {
  func.func @ffb_kernel(%arg0: i32, %arg1: memref<1x16x128xf32, #tpu.memory_space<vmem>>, %arg2: memref<1x16x128xf32, #tpu.memory_space<vmem>>, %arg3: memref<4x384x128xf32, #tpu.memory_space<vmem>>, %arg4: memref<4x1x128xf32, #tpu.memory_space<vmem>>, %arg5: memref<32x16xf32, #tpu.memory_space<vmem>>, %arg6: memref<128x256xf32, #tpu.memory_space<vmem>>, %arg7: memref<1x256xf32, #tpu.memory_space<vmem>>, %arg8: memref<1x32x256xf32, #tpu.memory_space<vmem>>) attributes {dimension_semantics = [#tpu.dimension_semantics<parallel>], iteration_bounds = array<i64: 1>, scalar_prefetch = 0 : i64, scratch_operands = 0 : i64, tpu.core_type = #tpu.core_type<tc>, window_params = [{transform_indices = @transform_0, window_bounds = array<i64: 1, 16, 128>}, {transform_indices = @transform_1, window_bounds = array<i64: 1, 16, 128>}, {pipeline_mode = #tpu.pipeline_mode<synchronous>, transform_indices = @transform_2, window_bounds = array<i64: 4, 384, 128>}, {pipeline_mode = #tpu.pipeline_mode<synchronous>, transform_indices = @transform_3, window_bounds = array<i64: 4, 1, 128>}, {pipeline_mode = #tpu.pipeline_mode<synchronous>, transform_indices = @transform_4, window_bounds = array<i64: 32, 16>}, {pipeline_mode = #tpu.pipeline_mode<synchronous>, transform_indices = @transform_5, window_bounds = array<i64: 128, 256>}, {pipeline_mode = #tpu.pipeline_mode<synchronous>, transform_indices = @transform_6, window_bounds = array<i64: 1, 256>}, {transform_indices = @transform_7, window_bounds = array<i64: 1, 32, 256>}]} {
    %c0 = arith.constant 0 : index
    %c0_0 = arith.constant 0 : index
    %c0_1 = arith.constant 0 : index
    %0 = vector.load %arg1[%c0, %c0_0, %c0_1] : memref<1x16x128xf32, #tpu.memory_space<vmem>>, vector<1x16x128xf32>
    %1 = vector.shape_cast %0 : vector<1x16x128xf32> to vector<16x128xf32>
    %c0_2 = arith.constant 0 : index
    %c0_3 = arith.constant 0 : index
    %c0_4 = arith.constant 0 : index
    %2 = vector.load %arg2[%c0_2, %c0_3, %c0_4] : memref<1x16x128xf32, #tpu.memory_space<vmem>>, vector<1x16x128xf32>
    %3 = vector.shape_cast %2 : vector<1x16x128xf32> to vector<16x128xf32>
    %4 = tpu.iota {dimensions = array<i32: 0>} : vector<16x128xi32>
    %c0_i32 = arith.constant 0 : i32
    %5 = vector.broadcast %c0_i32 : i32 to vector<16x128xi32>
    %6 = arith.cmpi eq, %4, %5 : vector<16x128xi32>
    %c15_i32 = arith.constant 15 : i32
    %7 = vector.broadcast %c15_i32 : i32 to vector<16x128xi32>
    %8 = arith.cmpi eq, %4, %7 : vector<16x128xi32>
    %cst = arith.constant 0.000000e+00 : f32
    %9 = vector.broadcast %cst : f32 to vector<16x128xf32>
    %10 = arith.maximumf %3, %9 : vector<16x128xf32>
    %c1_i32 = arith.constant 1 : i32
    %11 = tpu.dynamic_rotate %10 by %c1_i32 dim 0 : vector<16x128xf32>, i32 -> vector<16x128xf32>
    %cst_5 = arith.constant 0.000000e+00 : f32
    %12 = vector.broadcast %cst_5 : f32 to vector<16x128xf32>
    %13 = arith.select %6, %12, %11 : vector<16x128xi1>, vector<16x128xf32>
    %c15_i32_6 = arith.constant 15 : i32
    %14 = tpu.dynamic_rotate %10 by %c15_i32_6 dim 0 : vector<16x128xf32>, i32 -> vector<16x128xf32>
    %cst_7 = arith.constant 0.000000e+00 : f32
    %15 = vector.broadcast %cst_7 : f32 to vector<16x128xf32>
    %16 = arith.select %8, %15, %14 : vector<16x128xi1>, vector<16x128xf32>
    %17 = tpu.concatenate %13, %10, %16 in 1 : vector<16x128xf32>, vector<16x128xf32>, vector<16x128xf32> -> vector<16x384xf32>
    %c0_8 = arith.constant 0 : index
    %c0_9 = arith.constant 0 : index
    %c0_10 = arith.constant 0 : index
    %18 = vector.load %arg3[%c0_8, %c0_9, %c0_10] : memref<4x384x128xf32, #tpu.memory_space<vmem>>, vector<1x384x128xf32>
    %19 = vector.shape_cast %18 : vector<1x384x128xf32> to vector<384x128xf32>
    %cst_11 = arith.constant dense<0.000000e+00> : vector<16x128xf32>
    %20 = tpu.matmul %17, %19, %cst_11 {dimension_numbers = #tpu.dot_dimension_numbers<[1], [0], [0], [1], [0, 0, 1, 1], [], []>} : vector<16x384xf32>, vector<384x128xf32>, vector<16x128xf32> -> vector<16x128xf32>
    %c0_12 = arith.constant 0 : index
    %c0_13 = arith.constant 0 : index
    %c0_14 = arith.constant 0 : index
    %21 = vector.load %arg4[%c0_12, %c0_13, %c0_14] : memref<4x1x128xf32, #tpu.memory_space<vmem>>, vector<1x1x128xf32>
    %22 = vector.shape_cast %21 : vector<1x1x128xf32> to vector<1x128xf32>
    %23 = vector.broadcast %22 : vector<1x128xf32> to vector<16x128xf32>
    %24 = arith.addf %20, %23 : vector<16x128xf32>
    %cst_15 = arith.constant 0.000000e+00 : f32
    %25 = vector.broadcast %cst_15 : f32 to vector<16x128xf32>
    %26 = arith.maximumf %24, %25 : vector<16x128xf32>
    %c1_i32_16 = arith.constant 1 : i32
    %27 = tpu.dynamic_rotate %26 by %c1_i32_16 dim 0 : vector<16x128xf32>, i32 -> vector<16x128xf32>
    %cst_17 = arith.constant 0.000000e+00 : f32
    %28 = vector.broadcast %cst_17 : f32 to vector<16x128xf32>
    %29 = arith.select %6, %28, %27 : vector<16x128xi1>, vector<16x128xf32>
    %c15_i32_18 = arith.constant 15 : i32
    %30 = tpu.dynamic_rotate %26 by %c15_i32_18 dim 0 : vector<16x128xf32>, i32 -> vector<16x128xf32>
    %cst_19 = arith.constant 0.000000e+00 : f32
    %31 = vector.broadcast %cst_19 : f32 to vector<16x128xf32>
    %32 = arith.select %8, %31, %30 : vector<16x128xi1>, vector<16x128xf32>
    %33 = tpu.concatenate %29, %26, %32 in 1 : vector<16x128xf32>, vector<16x128xf32>, vector<16x128xf32> -> vector<16x384xf32>
    %c1 = arith.constant 1 : index
    %c0_20 = arith.constant 0 : index
    %c0_21 = arith.constant 0 : index
    %34 = vector.load %arg3[%c1, %c0_20, %c0_21] : memref<4x384x128xf32, #tpu.memory_space<vmem>>, vector<1x384x128xf32>
    %35 = vector.shape_cast %34 : vector<1x384x128xf32> to vector<384x128xf32>
    %cst_22 = arith.constant dense<0.000000e+00> : vector<16x128xf32>
    %36 = tpu.matmul %33, %35, %cst_22 {dimension_numbers = #tpu.dot_dimension_numbers<[1], [0], [0], [1], [0, 0, 1, 1], [], []>} : vector<16x384xf32>, vector<384x128xf32>, vector<16x128xf32> -> vector<16x128xf32>
    %c1_23 = arith.constant 1 : index
    %c0_24 = arith.constant 0 : index
    %c0_25 = arith.constant 0 : index
    %37 = vector.load %arg4[%c1_23, %c0_24, %c0_25] : memref<4x1x128xf32, #tpu.memory_space<vmem>>, vector<1x1x128xf32>
    %38 = vector.shape_cast %37 : vector<1x1x128xf32> to vector<1x128xf32>
    %39 = vector.broadcast %38 : vector<1x128xf32> to vector<16x128xf32>
    %40 = arith.addf %36, %39 : vector<16x128xf32>
    %41 = arith.addf %40, %3 : vector<16x128xf32>
    %42 = arith.addf %1, %41 : vector<16x128xf32>
    %cst_26 = arith.constant 0.000000e+00 : f32
    %43 = vector.broadcast %cst_26 : f32 to vector<16x128xf32>
    %44 = arith.maximumf %42, %43 : vector<16x128xf32>
    %c1_i32_27 = arith.constant 1 : i32
    %45 = tpu.dynamic_rotate %44 by %c1_i32_27 dim 0 : vector<16x128xf32>, i32 -> vector<16x128xf32>
    %cst_28 = arith.constant 0.000000e+00 : f32
    %46 = vector.broadcast %cst_28 : f32 to vector<16x128xf32>
    %47 = arith.select %6, %46, %45 : vector<16x128xi1>, vector<16x128xf32>
    %c15_i32_29 = arith.constant 15 : i32
    %48 = tpu.dynamic_rotate %44 by %c15_i32_29 dim 0 : vector<16x128xf32>, i32 -> vector<16x128xf32>
    %cst_30 = arith.constant 0.000000e+00 : f32
    %49 = vector.broadcast %cst_30 : f32 to vector<16x128xf32>
    %50 = arith.select %8, %49, %48 : vector<16x128xi1>, vector<16x128xf32>
    %51 = tpu.concatenate %47, %44, %50 in 1 : vector<16x128xf32>, vector<16x128xf32>, vector<16x128xf32> -> vector<16x384xf32>
    %c2 = arith.constant 2 : index
    %c0_31 = arith.constant 0 : index
    %c0_32 = arith.constant 0 : index
    %52 = vector.load %arg3[%c2, %c0_31, %c0_32] : memref<4x384x128xf32, #tpu.memory_space<vmem>>, vector<1x384x128xf32>
    %53 = vector.shape_cast %52 : vector<1x384x128xf32> to vector<384x128xf32>
    %cst_33 = arith.constant dense<0.000000e+00> : vector<16x128xf32>
    %54 = tpu.matmul %51, %53, %cst_33 {dimension_numbers = #tpu.dot_dimension_numbers<[1], [0], [0], [1], [0, 0, 1, 1], [], []>} : vector<16x384xf32>, vector<384x128xf32>, vector<16x128xf32> -> vector<16x128xf32>
    %c2_34 = arith.constant 2 : index
    %c0_35 = arith.constant 0 : index
    %c0_36 = arith.constant 0 : index
    %55 = vector.load %arg4[%c2_34, %c0_35, %c0_36] : memref<4x1x128xf32, #tpu.memory_space<vmem>>, vector<1x1x128xf32>
    %56 = vector.shape_cast %55 : vector<1x1x128xf32> to vector<1x128xf32>
    %57 = vector.broadcast %56 : vector<1x128xf32> to vector<16x128xf32>
    %58 = arith.addf %54, %57 : vector<16x128xf32>
    %cst_37 = arith.constant 0.000000e+00 : f32
    %59 = vector.broadcast %cst_37 : f32 to vector<16x128xf32>
    %60 = arith.maximumf %58, %59 : vector<16x128xf32>
    %c1_i32_38 = arith.constant 1 : i32
    %61 = tpu.dynamic_rotate %60 by %c1_i32_38 dim 0 : vector<16x128xf32>, i32 -> vector<16x128xf32>
    %cst_39 = arith.constant 0.000000e+00 : f32
    %62 = vector.broadcast %cst_39 : f32 to vector<16x128xf32>
    %63 = arith.select %6, %62, %61 : vector<16x128xi1>, vector<16x128xf32>
    %c15_i32_40 = arith.constant 15 : i32
    %64 = tpu.dynamic_rotate %60 by %c15_i32_40 dim 0 : vector<16x128xf32>, i32 -> vector<16x128xf32>
    %cst_41 = arith.constant 0.000000e+00 : f32
    %65 = vector.broadcast %cst_41 : f32 to vector<16x128xf32>
    %66 = arith.select %8, %65, %64 : vector<16x128xi1>, vector<16x128xf32>
    %67 = tpu.concatenate %63, %60, %66 in 1 : vector<16x128xf32>, vector<16x128xf32>, vector<16x128xf32> -> vector<16x384xf32>
    %c3 = arith.constant 3 : index
    %c0_42 = arith.constant 0 : index
    %c0_43 = arith.constant 0 : index
    %68 = vector.load %arg3[%c3, %c0_42, %c0_43] : memref<4x384x128xf32, #tpu.memory_space<vmem>>, vector<1x384x128xf32>
    %69 = vector.shape_cast %68 : vector<1x384x128xf32> to vector<384x128xf32>
    %cst_44 = arith.constant dense<0.000000e+00> : vector<16x128xf32>
    %70 = tpu.matmul %67, %69, %cst_44 {dimension_numbers = #tpu.dot_dimension_numbers<[1], [0], [0], [1], [0, 0, 1, 1], [], []>} : vector<16x384xf32>, vector<384x128xf32>, vector<16x128xf32> -> vector<16x128xf32>
    %c3_45 = arith.constant 3 : index
    %c0_46 = arith.constant 0 : index
    %c0_47 = arith.constant 0 : index
    %71 = vector.load %arg4[%c3_45, %c0_46, %c0_47] : memref<4x1x128xf32, #tpu.memory_space<vmem>>, vector<1x1x128xf32>
    %72 = vector.shape_cast %71 : vector<1x1x128xf32> to vector<1x128xf32>
    %73 = vector.broadcast %72 : vector<1x128xf32> to vector<16x128xf32>
    %74 = arith.addf %70, %73 : vector<16x128xf32>
    %75 = arith.addf %74, %42 : vector<16x128xf32>
    %c0_48 = arith.constant 0 : index
    %c0_49 = arith.constant 0 : index
    %76 = vector.load %arg6[%c0_48, %c0_49] : memref<128x256xf32, #tpu.memory_space<vmem>>, vector<128x256xf32>
    %cst_50 = arith.constant dense<0.000000e+00> : vector<16x256xf32>
    %77 = tpu.matmul %75, %76, %cst_50 {dimension_numbers = #tpu.dot_dimension_numbers<[1], [0], [0], [1], [0, 0, 1, 1], [], []>} : vector<16x128xf32>, vector<128x256xf32>, vector<16x256xf32> -> vector<16x256xf32>
    %c0_51 = arith.constant 0 : index
    %c0_52 = arith.constant 0 : index
    %78 = vector.load %arg5[%c0_51, %c0_52] : memref<32x16xf32, #tpu.memory_space<vmem>>, vector<32x16xf32>
    %cst_53 = arith.constant dense<0.000000e+00> : vector<32x256xf32>
    %79 = tpu.matmul %78, %77, %cst_53 {dimension_numbers = #tpu.dot_dimension_numbers<[1], [0], [0], [1], [0, 0, 1, 1], [], []>} : vector<32x16xf32>, vector<16x256xf32>, vector<32x256xf32> -> vector<32x256xf32>
    %c0_54 = arith.constant 0 : index
    %c0_55 = arith.constant 0 : index
    %80 = vector.load %arg7[%c0_54, %c0_55] : memref<1x256xf32, #tpu.memory_space<vmem>>, vector<1x256xf32>
    %81 = vector.broadcast %80 : vector<1x256xf32> to vector<32x256xf32>
    %82 = arith.addf %79, %81 : vector<32x256xf32>
    %c0_56 = arith.constant 0 : index
    %c0_57 = arith.constant 0 : index
    %c0_58 = arith.constant 0 : index
    %83 = vector.load %arg8[%c0_56, %c0_57, %c0_58] : memref<1x32x256xf32, #tpu.memory_space<vmem>>, vector<1x32x256xf32>
    %84 = vector.shape_cast %83 : vector<1x32x256xf32> to vector<32x256xf32>
    %85 = vector.shape_cast %82 : vector<32x256xf32> to vector<1x32x256xf32>
    tpu.vector_store %arg8[%c0_56, %c0_57, %c0_58], %85 {strides = array<i32>} : memref<1x32x256xf32, #tpu.memory_space<vmem>>, vector<1x32x256xf32>,
    return
  }
  func.func @transform_0(%arg0: i32) -> (i32, i32, i32) {
    %c0_i32 = arith.constant 0 : i32
    %c0_i32_0 = arith.constant 0 : i32
    %c0_i32_1 = arith.constant 0 : i32
    return %arg0, %c0_i32, %c0_i32_0 : i32, i32, i32
  }
  func.func @transform_1(%arg0: i32) -> (i32, i32, i32) {
    %c0_i32 = arith.constant 0 : i32
    %c0_i32_0 = arith.constant 0 : i32
    %c0_i32_1 = arith.constant 0 : i32
    return %arg0, %c0_i32, %c0_i32_0 : i32, i32, i32
  }
  func.func @transform_2(%arg0: i32) -> (i32, i32, i32) {
    %c0_i32 = arith.constant 0 : i32
    %c0_i32_0 = arith.constant 0 : i32
    %c0_i32_1 = arith.constant 0 : i32
    %c0_i32_2 = arith.constant 0 : i32
    return %c0_i32, %c0_i32_0, %c0_i32_1 : i32, i32, i32
  }
  func.func @transform_3(%arg0: i32) -> (i32, i32, i32) {
    %c0_i32 = arith.constant 0 : i32
    %c0_i32_0 = arith.constant 0 : i32
    %c0_i32_1 = arith.constant 0 : i32
    %c0_i32_2 = arith.constant 0 : i32
    return %c0_i32, %c0_i32_0, %c0_i32_1 : i32, i32, i32
  }
  func.func @transform_4(%arg0: i32) -> (i32, i32) {
    %c0_i32 = arith.constant 0 : i32
    %c0_i32_0 = arith.constant 0 : i32
    %c0_i32_1 = arith.constant 0 : i32
    return %c0_i32, %c0_i32_0 : i32, i32
  }
  func.func @transform_5(%arg0: i32) -> (i32, i32) {
    %c0_i32 = arith.constant 0 : i32
    %c0_i32_0 = arith.constant 0 : i32
    %c0_i32_1 = arith.constant 0 : i32
    return %c0_i32, %c0_i32_0 : i32, i32
  }
  func.func @transform_6(%arg0: i32) -> (i32, i32) {
    %c0_i32 = arith.constant 0 : i32
    %c0_i32_0 = arith.constant 0 : i32
    %c0_i32_1 = arith.constant 0 : i32
    return %c0_i32, %c0_i32_0 : i32, i32
  }
  func.func @transform_7(%arg0: i32) -> (i32, i32, i32) {
    %c0_i32 = arith.constant 0 : i32
    %c0_i32_0 = arith.constant 0 : i32
    %c0_i32_1 = arith.constant 0 : i32
    return %arg0, %c0_i32, %c0_i32_0 : i32, i32, i32
  }
}

</mosaic_0001>

<bundles_post_ra>
// kernel: tpu_custom_call.1
= control target key start
LH: loop header
LB: loop body
LE: loop exit
PB: predicated region body
PF: predicated region fallthrough
CT: control target
= control target key end

     0   :  { %12 = vsyncpa [#allocation3], 0  ;;  %s2188_s0 = inlined_call_operand.vmem [shape: f32[1,16,128], index: 0, kind: input, shape index: {}]   ;;  %s2189_s1 = inlined_call_operand.vmem [shape: f32[1,16,128], index: 1, kind: input, shape index: {}]   ;;  %s2190_s2 = inlined_call_operand.hbm [shape: f32[4,384,128], index: 2, kind: input, shape index: {}]   ;;  %s2191_s3 = inlined_call_operand.vmem [shape: f32[4,1,128], index: 3, kind: input, shape index: {}]   ;;  %s2192_s4 = inlined_call_operand.vmem [shape: f32[32,16], index: 4, kind: input, shape index: {}]   ;;  %s2193_s5 = inlined_call_operand.hbm [shape: f32[128,256], index: 5, kind: input, shape index: {}]   ;;  %s2194_s6 = inlined_call_operand.vmem [shape: f32[1,256], index: 6, kind: input, shape index: {}]   ;;  %s2195_s7 = inlined_call_operand.hbm [shape: f32[1,32,256], index: 7, kind: output, shape index: {}]  }
   0x1   :  { %13 = vsyncpa [#allocation6], 0 }
   0x2   :  { %14 = vsyncpa [#allocation4], 0  ;;  %s1974_s24 = smov [#allocation2]   ;;  %s1902_s28 = scalar_lea.hbm %s2190_s2, 24576 }
   0x3   :  { %s24_s25 = sshll.u32 %s1974_s24, 4  ;;  %p1903_p0 = scmp.ne.s32.totalorder %s2190_s2, %s1902_s28  ;;  %s25_s25 = int_to_ptr.vmem [resolvable:$true] %s24_s25 }
   0x4   :  { %p1906_p1 = scmp.lt.u32.totalorder %s1902_s28, %s2190_s2 }
   0x6   :  { %p1908_p2 = pnand %p1906_p1, %p1903_p0 }
   0x8   :  { %1911 = shalt.err (!%p1908_p2)
}
   0x9   :  { %s1912_s10 = scalar_lea.vmem %s25_s25, 24576  ;;  %p1917_p4 = scmp.lt.s32.totalorder %s25_s25, %s25_s25 }
   0xa   :  { %p1913_p3 = scmp.ne.s32.totalorder %s25_s25, %s1912_s10  ;;  %p1918_p5 = scmp.lt.s32.totalorder %s1912_s10, %s1912_s10 }
   0xc   :  { %p1919_p6 = por %p1918_p5, %p1917_p4 }
   0xe   :  { %p1920_p7 = pnand %p1919_p6, %p1913_p3 }
  0x10   :  { %1923 = shalt.err (!%p1920_p7)
}
  0x11   :  { %s1975_s11 = smov 128   ;;  %s1976_s12 = smov 8  }
  0x12   :  { %30 = dma.hbm_to_vmem [thread:$0]  %s2190_s2, 24576, %s25_s25, [#allocation3], %s1975_s11, %s1975_s11, %s1976_s12  }
  0x13   :  { %s1977_s15 = smov [#allocation5]   ;;  %s1924_s19 = scalar_lea.hbm %s2193_s5, 4096 }
  0x14   :  { %s40_s16 = sshll.u32 %s1977_s15, 4  ;;  %p1925_p8 = scmp.ne.s32.totalorder %s2193_s5, %s1924_s19  ;;  %s41_s16 = int_to_ptr.vmem [resolvable:$true] %s40_s16 }
  0x15   :  { %p1928_p9 = scmp.lt.u32.totalorder %s1924_s19, %s2193_s5 }
  0x17   :  { %p1930_p10 = pnand %p1928_p9, %p1925_p8 }
  0x19   :  { %1933 = shalt.err (!%p1930_p10)
}
  0x1a   :  { %s1934_s24 = scalar_lea.vmem %s41_s16, 4096  ;;  %p1939_p12 = scmp.lt.s32.totalorder %s41_s16, %s41_s16 }
  0x1b   :  { %p1935_p11 = scmp.ne.s32.totalorder %s41_s16, %s1934_s24  ;;  %p1940_p13 = scmp.lt.s32.totalorder %s1934_s24, %s1934_s24 }
  0x1d   :  { %p1941_p0 = por %p1940_p13, %p1939_p12 }
  0x1f   :  { %p1942_p1 = pnand %p1941_p0, %p1935_p11 }
  0x21   :  { %1945 = shalt.err (!%p1942_p1)
}
  0x22   :  { %s1978_s2 = smov 256   ;;  %s1979_s25 = smov 16  }
  0x23   :  { %46 = dma.hbm_to_vmem [thread:$0]  %s2193_s5, 4096, %s41_s16, [#allocation6], %s1978_s2, %s1978_s2, %s1979_s25  }
  0x24   :  { %1968 = dma.done.wait [#allocation3], 24576  }
  0x25   :  { %1969 = vsyncadd [#allocation3], 4294942720 }
  0x26   :  { %1970 = dma.done.wait [#allocation6], 4096  }
  0x27   :  { %1971 = vsyncadd [#allocation6], 4294963200  ;;  %v98_v0 = vld [vmem:[#allocation2 + $0x80] sm:$0xff]  ;;  %v99_v1 = vld [vmem:[#allocation2 + $0x88] sm:$0xff]  ;;  %v59_v37 = vlaneseq  ;;  %vm1081_vm4 = vcmask 130048  }
  0x28   :  { %v82_v2 = vld [vmem:[#allocation2] sm:$0xff]  ;;  %v1602_v3 = vpack.c.bf16 %v99_v1, %v98_v0  ;;  %v83_v4 = vld [vmem:[#allocation2 + $0x8] sm:$0xff]  ;;  %v100_v5 = vld [vmem:[#allocation2 + $0x90] sm:$0xff] }
  0x29   :  { %v101_v6 = vld [vmem:[#allocation2 + $0x98] sm:$0xff]  ;;  %v1604_v7 = vpack.c.bf16 %v83_v4, %v82_v2  ;;  %v114_v9 = vld [vmem:[#allocation2 + $0x100] sm:$0xff]  ;;  %v115_v10 = vld [vmem:[#allocation2 + $0x108] sm:$0xff]  ;;  %v2059_v49 = vshrl.u32 %v59_v37, 7 }
  0x2a   :  { %v1606_v8 = vpack.c.bf16 %v101_v6, %v100_v5  ;;  %v84_v11 = vld [vmem:[#allocation2 + $0x10] sm:$0xff]  ;;  %1603 = vmatprep.subr.bf16.mxu0 %v1602_v3  ;;  %v1634_v12 = vpack.c.bf16 %v115_v10, %v114_v9  ;;  %v85_v13 = vld [vmem:[#allocation2 + $0x18] sm:$0xff]  ;;  %v102_v14 = vld [vmem:[#allocation2 + $0xa0] sm:$0xff] }
  0x2b   :  { %v103_v15 = vld [vmem:[#allocation2 + $0xa8] sm:$0xff]  ;;  %1605 = vmatpush3.bf16.msra.mxu0 %v1604_v7  ;;  %v1608_v16 = vpack.c.bf16 %v85_v13, %v84_v11  ;;  %v116_v17 = vld [vmem:[#allocation2 + $0x110] sm:$0xff]  ;;  %v117_v18 = vld [vmem:[#allocation2 + $0x118] sm:$0xff]  ;;  %vm77_vm0 = vcmp.lt.s32.totalorder %v2059_v49, 7  ;;  %vm70_vm1 = vcmp.lt.s32.totalorder %v2059_v49, 1  ;;  %vm1236_vm2 = vcmp.ne.s32.totalorder %v2059_v49, 0 }
  0x2c   :  { %1607 = vmatprep.subr.bf16.mxu0 %v1606_v8  ;;  %1635 = vmatprep.subr.bf16.mxu1 %v1634_v12  ;;  %v1610_v19 = vpack.c.bf16 %v103_v15, %v102_v14  ;;  %v1638_v20 = vpack.c.bf16 %v117_v18, %v116_v17  ;;  %v86_v21 = vld [vmem:[#allocation2 + $0x20] sm:$0xff]  ;;  %v87_v22 = vld [vmem:[#allocation2 + $0x28] sm:$0xff]  ;;  %v104_v23 = vld [vmem:[#allocation2 + $0xb0] sm:$0xff] }
  0x2d   :  { %1637 = vmatpush3.bf16.msra.mxu1 %v1634_v12  ;;  %v105_v24 = vld [vmem:[#allocation2 + $0xb8] sm:$0xff]  ;;  %v118_v25 = vld [vmem:[#allocation2 + $0x120] sm:$0xff]  ;;  %v119_v26 = vld [vmem:[#allocation2 + $0x128] sm:$0xff]  ;;  %v1612_v28 = vpack.c.bf16 %v87_v22, %v86_v21 }
  0x2e   :  { %1639 = vmatprep.subr.bf16.mxu1 %v1638_v20  ;;  %v1642_v27 = vpack.c.bf16 %v119_v26, %v118_v25  ;;  %v120_v29 = vld [vmem:[#allocation2 + $0x130] sm:$0xff]  ;;  %v121_v30 = vld [vmem:[#allocation2 + $0x138] sm:$0xff]  ;;  %v1614_v31 = vpack.c.bf16 %v105_v24, %v104_v23  ;;  %v106_v34 = vld [vmem:[#allocation2 + $0xc0] sm:$0xff]  ;;  %v2077_v26 = vadd.s32 8, %v2059_v49 }
  0x2f   :  { %1609 = vmatpush3.bf16.msra.mxu0 %v1608_v16  ;;  %v88_v32 = vld [vmem:[#allocation2 + $0x30] sm:$0xff]  ;;  %v89_v33 = vld [vmem:[#allocation2 + $0x38] sm:$0xff]  ;;  %v107_v35 = vld [vmem:[#allocation2 + $0xc8] sm:$0xff]  ;;  %v1646_v36 = vpack.c.bf16 %v121_v30, %v120_v29 }
  0x30   :  { %1611 = vmatprep.subr.bf16.mxu0 %v1610_v19  ;;  %v1616_v38 = vpack.c.bf16 %v89_v33, %v88_v32  ;;  %v122_v39 = vld [vmem:[#allocation2 + $0x140] sm:$0xff]  ;;  %v123_v40 = vld [vmem:[#allocation2 + $0x148] sm:$0xff]  ;;  %v1618_v41 = vpack.c.bf16 %v107_v35, %v106_v34  ;;  %v108_v44 = vld [vmem:[#allocation2 + $0xd0] sm:$0xff]  ;;  %vm1237_vm3 = vcmp.ne.s32.totalorder %v2077_v26, 15 }
  0x31   :  { %1641 = vmatpush3.bf16.msra.mxu1 %v1638_v20  ;;  %v90_v42 = vld [vmem:[#allocation2 + $0x40] sm:$0xff]  ;;  %v91_v43 = vld [vmem:[#allocation2 + $0x48] sm:$0xff]  ;;  %v109_v45 = vld [vmem:[#allocation2 + $0xd8] sm:$0xff]  ;;  %v1650_v46 = vpack.c.bf16 %v123_v40, %v122_v39 }
  0x32   :  { %1643 = vmatprep.subr.bf16.mxu1 %v1642_v27  ;;  %v2052_v47 = vld [vmem:[%s2189_s1] sm:$0xff]  ;;  %v2057_v48 = vld [vmem:[%s2189_s1 + $0x8] sm:$0xff]  ;;  %v1620_v50 = vpack.c.bf16 %v91_v43, %v90_v42  ;;  %v124_v51 = vld [vmem:[#allocation2 + $0x150] sm:$0xff]  ;;  %v1622_v55 = vpack.c.bf16 %v109_v45, %v108_v44 }
  0x33   :  { %1613 = vmatpush3.bf16.msra.mxu0 %v1612_v28  ;;  %v125_v52 = vld [vmem:[#allocation2 + $0x158] sm:$0xff]  ;;  %v2062_v53 = vmax.f32 %v2052_v47, 0.0  ;;  %v2065_v54 = vmax.f32 %v2057_v48, 0.0  ;;  %v92_v56 = vld [vmem:[#allocation2 + $0x50] sm:$0xff]  ;;  %v110_v58 = vld [vmem:[#allocation2 + $0xe0] sm:$0xff] }
  0x34   :  { %1615 = vmatprep.subr.bf16.mxu0 %v1614_v31  ;;  %v93_v57 = vld [vmem:[#allocation2 + $0x58] sm:$0xff]  ;;  %v111_v59 = vld [vmem:[#allocation2 + $0xe8] sm:$0xff]  ;;  %v1654_v62 = vpack.c.bf16 %v125_v52, %v124_v51  ;;  %v126_v0 = vld [vmem:[#allocation2 + $0x160] sm:$0xff] }
  0x35   :  { %1645 = vmatpush3.bf16.msra.mxu1 %v1642_v27  ;;  %201 = vmatprep.mubr.f32.mxu0 %v2062_v53  ;;  %v75_v60 = vrot.slane %v2062_v53, 1  ;;  %v76_v61 = vrot.slane %v2065_v54, 1  ;;  %v1624_v63 = vpack.c.bf16 %v93_v57, %v92_v56  ;;  %v127_v1 = vld [vmem:[#allocation2 + $0x168] sm:$0xff]  ;;  %v1626_v3 = vpack.c.bf16 %v111_v59, %v110_v58  ;;  %v94_v4 = vld [vmem:[#allocation2 + $0x60] sm:$0xff]  ;;  %v112_v6 = vld [vmem:[#allocation2 + $0xf0] sm:$0xff] }
  0x36   :  { %1647 = vmatprep.subr.bf16.mxu1 %v1646_v36  ;;  %v95_v5 = vld [vmem:[#allocation2 + $0x68] sm:$0xff]  ;;  %v113_v7 = vld [vmem:[#allocation2 + $0xf8] sm:$0xff]  ;;  %v1658_v8 = vpack.c.bf16 %v127_v1, %v126_v0  ;;  %v128_v10 = vld [vmem:[#allocation2 + $0x170] sm:$0xff]  ;;  %v68_v19 = vrot.slane %v2062_v53, 7  ;;  %v69_v20 = vrot.slane %v2065_v54, 7 }
  0x37   :  { %1617 = vmatpush3.bf16.msra.mxu0 %v1616_v38  ;;  %v78_v2 = vsel %vm77_vm0, %v75_v60, %v76_v61  ;;  %v1628_v9 = vpack.c.bf16 %v95_v5, %v94_v4  ;;  %v129_v11 = vld [vmem:[#allocation2 + $0x178] sm:$0xff]  ;;  %v1630_v12 = vpack.c.bf16 %v113_v7, %v112_v6  ;;  %v96_v13 = vld [vmem:[#allocation2 + $0x70] sm:$0xff]  ;;  %v318_v15 = vld [vmem:[#allocation2 + $0x200] sm:$0xff]  ;;  %v79_v37 = vsel %vm77_vm0, %v76_v61, %v75_v60 }
  0x38   :  { %1619 = vmatprep.subr.bf16.mxu0 %v1618_v41  ;;  %1494 = vmatprep.mubr.f32.mxu1 %v78_v2  ;;  %v97_v14 = vld [vmem:[#allocation2 + $0x78] sm:$0xff]  ;;  %v319_v16 = vld [vmem:[#allocation2 + $0x208] sm:$0xff]  ;;  %v1662_v17 = vpack.c.bf16 %v129_v11, %v128_v10  ;;  %v334_v21 = vld [vmem:[#allocation2 + $0x280] sm:$0xff]  ;;  %v72_v30 = vsel %vm70_vm1, %v69_v20, %v68_v19  ;;  %v71_v41 = vsel %vm70_vm1, %v68_v19, %v69_v20 }
  0x39   :  { %1649 = vmatpush3.bf16.msra.mxu1 %v1646_v36  ;;  %v1632_v18 = vpack.c.bf16 %v97_v14, %v96_v13  ;;  %v335_v22 = vld [vmem:[#allocation2 + $0x288] sm:$0xff]  ;;  %v1666_v23 = vpack.c.bf16 %v319_v16, %v318_v15  ;;  %v302_v24 = vld [vmem:[#allocation2 + $0x180] sm:$0xff]  ;;  %v320_v27 = vld [vmem:[#allocation2 + $0x210] sm:$0xff] }
  0x3a   :  { %1651 = vmatprep.subr.bf16.mxu1 %v1650_v46  ;;  %v303_v25 = vld [vmem:[#allocation2 + $0x188] sm:$0xff]  ;;  %v321_v28 = vld [vmem:[#allocation2 + $0x218] sm:$0xff]  ;;  %v1698_v29 = vpack.c.bf16 %v335_v22, %v334_v21  ;;  %v336_v32 = vld [vmem:[#allocation2 + $0x290] sm:$0xff] }
  0x3b   :  { %1621 = vmatpush3.bf16.msra.mxu0 %v1620_v50  ;;  %v1668_v31 = vpack.c.bf16 %v303_v25, %v302_v24  ;;  %v337_v33 = vld [vmem:[#allocation2 + $0x298] sm:$0xff]  ;;  %v1670_v34 = vpack.c.bf16 %v321_v28, %v320_v27  ;;  %v304_v35 = vld [vmem:[#allocation2 + $0x190] sm:$0xff]  ;;  %v322_v38 = vld [vmem:[#allocation2 + $0x220] sm:$0xff] }
  0x3c   :  { %1623 = vmatprep.subr.bf16.mxu0 %v1622_v55  ;;  %v305_v36 = vld [vmem:[#allocation2 + $0x198] sm:$0xff]  ;;  %v323_v39 = vld [vmem:[#allocation2 + $0x228] sm:$0xff]  ;;  %v1702_v40 = vpack.c.bf16 %v337_v33, %v336_v32  ;;  %v338_v43 = vld [vmem:[#allocation2 + $0x2a0] sm:$0xff] }
  0x3d   :  { %1653 = vmatpush3.bf16.msra.mxu1 %v1650_v46  ;;  %v1672_v42 = vpack.c.bf16 %v305_v36, %v304_v35  ;;  %v339_v44 = vld [vmem:[#allocation2 + $0x2a8] sm:$0xff]  ;;  %v1674_v45 = vpack.c.bf16 %v323_v39, %v322_v38  ;;  %v306_v46 = vld [vmem:[#allocation2 + $0x1a0] sm:$0xff]  ;;  %v324_v51 = vld [vmem:[#allocation2 + $0x230] sm:$0xff] }
  0x3e   :  { %1655 = vmatprep.subr.bf16.mxu1 %v1654_v62  ;;  %v307_v50 = vld [vmem:[#allocation2 + $0x1a8] sm:$0xff]  ;;  %v325_v52 = vld [vmem:[#allocation2 + $0x238] sm:$0xff]  ;;  %v1706_v53 = vpack.c.bf16 %v339_v44, %v338_v43  ;;  %v340_v55 = vld [vmem:[#allocation2 + $0x2b0] sm:$0xff] }
  0x3f   :  { %1625 = vmatpush3.bf16.msra.mxu0 %v1624_v63  ;;  %v341_v56 = vld [vmem:[#allocation2 + $0x2b8] sm:$0xff]  ;;  %v1678_v57 = vpack.c.bf16 %v325_v52, %v324_v51  ;;  %v308_v58 = vld [vmem:[#allocation2 + $0x1b0] sm:$0xff]  ;;  %v327_v63 = vld [vmem:[#allocation2 + $0x248] sm:$0xff] }
  0x40   :  { %1627 = vmatprep.subr.bf16.mxu0 %v1626_v3  ;;  %v309_v59 = vld [vmem:[#allocation2 + $0x1b8] sm:$0xff]  ;;  %v1710_v60 = vpack.c.bf16 %v341_v56, %v340_v55  ;;  %v310_v1 = vld [vmem:[#allocation2 + $0x1c0] sm:$0xff]  ;;  %v311_v2 = vld [vmem:[#allocation2 + $0x1c8] sm:$0xff] }
  0x41   :  { %1657 = vmatpush3.bf16.msra.mxu1 %v1654_v62  ;;  %v1680_v61 = vpack.c.bf16 %v309_v59, %v308_v58  ;;  %v326_v62 = vld [vmem:[#allocation2 + $0x240] sm:$0xff]  ;;  %v1684_v4 = vpack.c.bf16 %v311_v2, %v310_v1  ;;  %v343_v5 = vld [vmem:[#allocation2 + $0x2c8] sm:$0xff]  ;;  %v328_v7 = vld [vmem:[#allocation2 + $0x250] sm:$0xff] }
  0x42   :  { %1659 = vmatprep.subr.bf16.mxu1 %v1658_v8  ;;  %v1682_v0 = vpack.c.bf16 %v327_v63, %v326_v62  ;;  %v342_v3 = vld [vmem:[#allocation2 + $0x2c0] sm:$0xff]  ;;  %v312_v10 = vld [vmem:[#allocation2 + $0x1d0] sm:$0xff]  ;;  %v313_v11 = vld [vmem:[#allocation2 + $0x1d8] sm:$0xff] }
  0x43   :  { %1629 = vmatpush3.bf16.msra.mxu0 %v1628_v9  ;;  %v1714_v6 = vpack.c.bf16 %v343_v5, %v342_v3  ;;  %v344_v13 = vld [vmem:[#allocation2 + $0x2d0] sm:$0xff]  ;;  %v345_v14 = vld [vmem:[#allocation2 + $0x2d8] sm:$0xff]  ;;  %v330_v16 = vld [vmem:[#allocation2 + $0x260] sm:$0xff] }
  0x44   :  { %1631 = vmatprep.subr.bf16.mxu0 %v1630_v12  ;;  %v1688_v12 = vpack.c.bf16 %v313_v11, %v312_v10  ;;  %v1718_v15 = vpack.c.bf16 %v345_v14, %v344_v13  ;;  %v314_v19 = vld [vmem:[#allocation2 + $0x1e0] sm:$0xff]  ;;  %v315_v20 = vld [vmem:[#allocation2 + $0x1e8] sm:$0xff]  ;;  %v332_v25 = vld [vmem:[#allocation2 + $0x270] sm:$0xff] }
  0x45   :  { %1661 = vmatpush3.bf16.msra.mxu1 %v1658_v8  ;;  %v329_v8 = vld [vmem:[#allocation2 + $0x258] sm:$0xff]  ;;  %v346_v21 = vld [vmem:[#allocation2 + $0x2e0] sm:$0xff]  ;;  %v1692_v22 = vpack.c.bf16 %v315_v20, %v314_v19  ;;  %v544_v36 = vld [vmem:[#allocation2 + $0x388] sm:$0xff] }
  0x46   :  { %1663 = vmatprep.subr.bf16.mxu1 %v1662_v17  ;;  %v1686_v9 = vpack.c.bf16 %v329_v8, %v328_v7  ;;  %v333_v27 = vld [vmem:[#allocation2 + $0x278] sm:$0xff]  ;;  %v543_v35 = vld [vmem:[#allocation2 + $0x380] sm:$0xff]  ;;  %v560_v39 = vld [vmem:[#allocation2 + $0x408] sm:$0xff] }
  0x47   :  { %1633 = vmatpush3.bf16.msra.mxu0 %v1632_v18  ;;  %v1694_v28 = vpack.c.bf16 %v333_v27, %v332_v25  ;;  %v349_v33 = vld [vmem:[#allocation2 + $0x2f8] sm:$0xff]  ;;  %v559_v38 = vld [vmem:[#allocation2 + $0x400] sm:$0xff]  ;;  %v528_v59 = vld [vmem:[#allocation2 + $0x308] sm:$0xff] }
  0x48   :  { %1667 = vmatprep.subr.bf16.mxu0 %v1666_v23  ;;  %v347_v23 = vld [vmem:[#allocation2 + $0x2e8] sm:$0xff]  ;;  %v1209_v43 = vld [vmem:[%s2191_s3] ss:$0 sm:$0xff]  ;;  %v546_v62 = vld [vmem:[#allocation2 + $0x398] sm:$0xff] }
  0x49   :  { %1665 = vmatpush3.bf16.msra.mxu1 %v1662_v17  ;;  %v331_v17 = vld [vmem:[#allocation2 + $0x268] sm:$0xff]  ;;  %v1722_v24 = vpack.c.bf16 %v347_v23, %v346_v21  ;;  %v527_v58 = vld [vmem:[#allocation2 + $0x300] sm:$0xff]  ;;  %v561_v63 = vld [vmem:[#allocation2 + $0x410] sm:$0xff] }
  0x4a   :  { %1211 = vmatmul.mubr.msk.f32.vlgmr.msra.gmra.mrb[0].mxu0 %vm1236_vm2, %v72_v30  ;;  %1699 = vmatprep.subr.bf16.mxu1 %v1698_v29  ;;  %v1690_v18 = vpack.c.bf16 %v331_v17, %v330_v16  ;;  %v317_v30 = vld [vmem:[#allocation2 + $0x1f8] sm:$0xff]  ;;  %v1732_v5 = vpack.c.bf16 %v528_v59, %v527_v58  ;;  %v547_v14 = vld [vmem:[#allocation2 + $0x3a0] sm:$0xff]  ;;  %v564_v17 = vld [vmem:[#allocation2 + $0x428] sm:$0xff] }
  0x4b   :  { %206 = vmatprep.mubr.f32.mxu0 %v2065_v54  ;;  %1669 = vmatpush3.bf16.msra.mxu0 %v1668_v31  ;;  %v1676_v54 = vpack.c.bf16 %v307_v50, %v306_v46  ;;  %v348_v31 = vld [vmem:[#allocation2 + $0x2f0] sm:$0xff]  ;;  %v530_v13 = vld [vmem:[#allocation2 + $0x318] sm:$0xff]  ;;  %v563_v16 = vld [vmem:[#allocation2 + $0x420] sm:$0xff] }
  0x4c   :  { %1495 = vmatmul.mubr.msk.f32.vlgmr.msra.gmra.mrb[0].mxu1 %vm1237_vm3, %v79_v37  ;;  %1671 = vmatprep.subr.bf16.mxu0 %v1670_v34  ;;  %v1726_v34 = vpack.c.bf16 %v349_v33, %v348_v31  ;;  %v1730_v37 = vpack.c.bf16 %v544_v36, %v543_v35  ;;  %v531_v20 = vld [vmem:[#allocation2 + $0x320] sm:$0xff]  ;;  %v532_v21 = vld [vmem:[#allocation2 + $0x328] sm:$0xff]  ;;  %v550_v25 = vld [vmem:[#allocation2 + $0x3b8] sm:$0xff] }
  0x4d   :  { %1701 = vmatpush3.bf16.msra.mxu1 %v1698_v29  ;;  %v316_v29 = vld [vmem:[#allocation2 + $0x1f0] sm:$0xff]  ;;  %v1740_v23 = vpack.c.bf16 %v532_v21, %v531_v20  ;;  %v552_v35 = vld [vmem:[#allocation2 + $0x3c8] sm:$0xff]  ;;  %v535_v36 = vld [vmem:[#allocation2 + $0x340] sm:$0xff] }
  0x4e   :  { %207 = vmatmul.mubr.f32.gmra.mrb[2].mxu0 %v71_v41  ;;  %1703 = vmatprep.subr.bf16.mxu1 %v1702_v40  ;;  %v1696_v32 = vpack.c.bf16 %v317_v30, %v316_v29  ;;  %v534_v29 = vld [vmem:[#allocation2 + $0x338] sm:$0xff]  ;;  %v565_v30 = vld [vmem:[#allocation2 + $0x430] sm:$0xff]  ;;  %v539_v58 = vld [vmem:[#allocation2 + $0x360] sm:$0xff] }
  0x4f   :  { %1673 = vmatpush3.bf16.msra.mxu0 %v1672_v42  ;;  %v540_v59 = vld [vmem:[#allocation2 + $0x368] sm:$0xff] }
  0x50   :  { %1675 = vmatprep.subr.bf16.mxu0 %v1674_v45 }
  0x51   :  { %1705 = vmatpush3.bf16.msra.mxu1 %v1702_v40  ;;  %v1762_v40 = vpack.c.bf16 %v560_v39, %v559_v38 }
  0x52   :  { %1707 = vmatprep.subr.bf16.mxu1 %v1706_v53 }
  0x53   :  { %1677 = vmatpush3.bf16.msra.mxu0 %v1676_v54 }
  0x54   :  { %1679 = vmatprep.subr.bf16.mxu0 %v1678_v57 }
  0x55   :  { %1709 = vmatpush3.bf16.msra.mxu1 %v1706_v53 }
  0x56   :  { %1711 = vmatprep.subr.bf16.mxu1 %v1710_v60 }
  0x57   :  { %1681 = vmatpush3.bf16.msra.mxu0 %v1680_v61 }
  0x58   :  { %1683 = vmatprep.subr.bf16.mxu0 %v1682_v0  ;;  %v562_v0 = vld [vmem:[#allocation2 + $0x418] sm:$0xff] }
  0x59   :  { %1713 = vmatpush3.bf16.msra.mxu1 %v1710_v60  ;;  %v545_v60 = vld [vmem:[#allocation2 + $0x390] sm:$0xff]  ;;  %v1766_v7 = vpack.c.bf16 %v562_v0, %v561_v63 }
  0x5a   :  { %1715 = vmatprep.subr.bf16.mxu1 %v1714_v6  ;;  %v557_v0 = vld [vmem:[#allocation2 + $0x3f0] sm:$0xff] }
  0x5b   :  { %1685 = vmatpush3.bf16.msra.mxu0 %v1684_v4 }
  0x5c   :  { %1687 = vmatprep.subr.bf16.mxu0 %v1686_v9 }
  0x5d   :  { %1717 = vmatpush3.bf16.msra.mxu1 %v1714_v6  ;;  %v1734_v6 = vpack.c.bf16 %v546_v62, %v545_v60  ;;  %v571_v60 = vld [vmem:[#allocation2 + $0x460] sm:$0xff]  ;;  %v572_v62 = vld [vmem:[#allocation2 + $0x468] sm:$0xff] }
  0x5e   :  { %1719 = vmatprep.subr.bf16.mxu1 %v1718_v15  ;;  %v1786_v63 = vpack.c.bf16 %v572_v62, %v571_v60 }
  0x5f   :  { %1689 = vmatpush3.bf16.msra.mxu0 %v1688_v12  ;;  %v529_v12 = vld [vmem:[#allocation2 + $0x310] sm:$0xff] }
  0x60   :  { %1691 = vmatprep.subr.bf16.mxu0 %v1690_v18  ;;  %v1736_v18 = vpack.c.bf16 %v530_v13, %v529_v12  ;;  %v780_v12 = vld [vmem:[#allocation2 + $0x580] sm:$0xff]  ;;  %v781_v13 = vld [vmem:[#allocation2 + $0x588] sm:$0xff] }
  0x61   :  { %1721 = vmatpush3.bf16.msra.mxu1 %v1718_v15  ;;  %v548_v15 = vld [vmem:[#allocation2 + $0x3a8] sm:$0xff] }
  0x62   :  { %1723 = vmatprep.subr.bf16.mxu1 %v1722_v24  ;;  %v1738_v19 = vpack.c.bf16 %v548_v15, %v547_v14  ;;  %v1826_v14 = vpack.c.bf16 %v781_v13, %v780_v12  ;;  %v772_v12 = vld [vmem:[#allocation2 + $0x540] sm:$0xff]  ;;  %v773_v13 = vld [vmem:[#allocation2 + $0x548] sm:$0xff] }
  0x63   :  { %1693 = vmatpush3.bf16.msra.mxu0 %v1692_v22  ;;  %v1770_v22 = vpack.c.bf16 %v564_v17, %v563_v16 }
  0x64   :  { %1695 = vmatprep.subr.bf16.mxu0 %v1694_v28  ;;  %v533_v28 = vld [vmem:[#allocation2 + $0x330] sm:$0xff] }
  0x65   :  { %1725 = vmatpush3.bf16.msra.mxu1 %v1722_v24  ;;  %v549_v24 = vld [vmem:[#allocation2 + $0x3b0] sm:$0xff]  ;;  %v1744_v31 = vpack.c.bf16 %v534_v29, %v533_v28 }
  0x66   :  { %1727 = vmatprep.subr.bf16.mxu1 %v1726_v34  ;;  %v1742_v27 = vpack.c.bf16 %v550_v25, %v549_v24 }
  0x67   :  { %1697 = vmatpush3.bf16.msra.mxu0 %v1696_v32  ;;  %v566_v32 = vld [vmem:[#allocation2 + $0x438] sm:$0xff] }
  0x68   :  { %1731 = vmatprep.subr.bf16.mxu0 %v1730_v37  ;;  %v1774_v33 = vpack.c.bf16 %v566_v32, %v565_v30  ;;  %v536_v37 = vld [vmem:[#allocation2 + $0x348] sm:$0xff] }
  0x69   :  { %1729 = vmatpush3.bf16.msra.mxu1 %v1726_v34  ;;  %v551_v34 = vld [vmem:[#allocation2 + $0x3c0] sm:$0xff]  ;;  %v1748_v39 = vpack.c.bf16 %v536_v37, %v535_v36  ;;  %v56_v32 = vld [vmem:[%s2188_s0 + $0x8] sm:$0xff] }
  0x6a   :  { %1763 = vmatprep.subr.bf16.mxu1 %v1762_v40  ;;  %v1746_v38 = vpack.c.bf16 %v552_v35, %v551_v34  ;;  %v748_v36 = vld [vmem:[#allocation2 + $0x480] sm:$0xff] }
 0x11d   :  { %v1270_v41 = vpop.f32.mrb[0].mxu0 }
 0x11e   :  { %v1271_v42 = vpop.f32.mrb[1].mxu0 }
 0x11f   :  { %v1272_v44 = vadd.f32 %v1271_v42, %v1270_v41  ;;  %v1496_v45 = vpop.f32.mrb[0].mxu1  ;;  %v568_v41 = vld [vmem:[#allocation2 + $0x448] sm:$0xff] }
 0x120   :  { %v278_v46 = vpop.f32.mrb[1].mxu1 }
 0x121   :  { %v1273_v50 = vpop.f32.mrb[2].mxu0  ;;  %v204_v51 = vadd.f32 %v1272_v44, %v1209_v43  ;;  %v554_v44 = vld [vmem:[#allocation2 + $0x3d8] sm:$0xff] }
 0x122   :  { %v1274_v52 = vpop.f32.mrb[3].mxu0 }
 0x123   :  { %v1275_v53 = vadd.f32 %v1274_v52, %v1273_v50  ;;  %v279_v54 = vadd.f32 %v278_v46, %v204_v51  ;;  %v537_v46 = vld [vmem:[#allocation2 + $0x350] sm:$0xff]  ;;  %v538_v50 = vld [vmem:[#allocation2 + $0x358] sm:$0xff] }
 0x124   :  { %v569_v51 = vld [vmem:[#allocation2 + $0x450] sm:$0xff]  ;;  %v1752_v52 = vpack.c.bf16 %v538_v50, %v537_v46 }
 0x125   :  { %v209_v55 = vadd.f32 %v1275_v53, %v1209_v43  ;;  %v287_v56 = vmax.f32 %v279_v54, 0.0  ;;  %v553_v43 = vld [vmem:[#allocation2 + $0x3d0] sm:$0xff]  ;;  %v570_v53 = vld [vmem:[#allocation2 + $0x458] sm:$0xff] }
 0x126   :  { %v1782_v54 = vpack.c.bf16 %v570_v53, %v569_v51  ;;  %v750_v53 = vld [vmem:[#allocation2 + $0x490] sm:$0xff] }
 0x127   :  { %v284_v57 = vadd.f32 %v1496_v45, %v209_v55  ;;  %422 = vmatprep.mubr.f32.mxu0 %v287_v56  ;;  %v289_v2 = vrot.slane %v287_v56, 7  ;;  %v295_v3 = vrot.slane %v287_v56, 1  ;;  %v1750_v45 = vpack.c.bf16 %v554_v44, %v553_v43  ;;  %v555_v55 = vld [vmem:[#allocation2 + $0x3e0] sm:$0xff]  ;;  %v556_v56 = vld [vmem:[#allocation2 + $0x3e8] sm:$0xff] }
 0x129   :  { %v288_v61 = vmax.f32 %v284_v57, 0.0  ;;  %v1754_v57 = vpack.c.bf16 %v556_v56, %v555_v55  ;;  %v768_v56 = vld [vmem:[#allocation2 + $0x520] sm:$0xff] }
 0x12b   :  { %v290_v1 = vrot.slane %v288_v61, 7  ;;  %v296_v4 = vrot.slane %v288_v61, 1 }
 0x12d   :  { %v292_v8 = vsel %vm70_vm1, %v290_v1, %v289_v2  ;;  %v297_v9 = vsel %vm77_vm0, %v295_v3, %v296_v4  ;;  %v298_v10 = vsel %vm77_vm0, %v296_v4, %v295_v3  ;;  %v291_v11 = vsel %vm70_vm1, %v289_v2, %v290_v1  ;;  %v558_v1 = vld [vmem:[#allocation2 + $0x3f8] sm:$0xff]  ;;  %v541_v3 = vld [vmem:[#allocation2 + $0x370] sm:$0xff] }
 0x12e   :  { %1217 = vmatmul.mubr.msk.f32.vlgmr.msra.gmra.mrb[4].mxu0 %vm1236_vm2, %v292_v8  ;;  %1529 = vmatprep.mubr.f32.mxu1 %v297_v9  ;;  %v1758_v2 = vpack.c.bf16 %v558_v1, %v557_v0  ;;  %v542_v4 = vld [vmem:[#allocation2 + $0x378] sm:$0xff]  ;;  %v764_v9 = vld [vmem:[#allocation2 + $0x500] sm:$0xff]  ;;  %v753_v0 = vld [vmem:[#allocation2 + $0x4a8] sm:$0xff] }
 0x12f   :  { %427 = vmatprep.mubr.f32.mxu0 %v288_v61  ;;  %1530 = vmatmul.mubr.msk.f32.vlgmr.msra.gmra.mrb[2].mxu1 %vm1237_vm3, %v298_v10  ;;  %v1756_v61 = vpack.c.bf16 %v540_v59, %v539_v58  ;;  %v765_v10 = vld [vmem:[#allocation2 + $0x508] sm:$0xff]  ;;  %v784_v58 = vld [vmem:[#allocation2 + $0x5a0] sm:$0xff] }
 0x130   :  { %1733 = vmatpush3.bf16.msra.mxu0 %v1732_v5  ;;  %1765 = vmatpush3.bf16.msra.mxu1 %v1762_v40  ;;  %v567_v40 = vld [vmem:[#allocation2 + $0x440] sm:$0xff]  ;;  %v573_v5 = vld [vmem:[#allocation2 + $0x470] sm:$0xff]  ;;  %v785_v59 = vld [vmem:[#allocation2 + $0x5a8] sm:$0xff] }
 0x131   :  { %1735 = vmatprep.subr.bf16.mxu0 %v1734_v6  ;;  %1767 = vmatprep.subr.bf16.mxu1 %v1766_v7  ;;  %v1778_v42 = vpack.c.bf16 %v568_v41, %v567_v40  ;;  %v1760_v6 = vpack.c.bf16 %v542_v4, %v541_v3  ;;  %v782_v40 = vld [vmem:[#allocation2 + $0x590] sm:$0xff]  ;;  %v783_v41 = vld [vmem:[#allocation2 + $0x598] sm:$0xff]  ;;  %v1834_v1 = vpack.c.bf16 %v785_v59, %v784_v58  ;;  %v1221_v58 = vld [vmem:[%s2191_s3 + $0x2] ss:$0 sm:$0xff] }
 0x132   :  { %428 = vmatmul.mubr.f32.gmra.mrb[6].mxu0 %v291_v11  ;;  %v1794_v11 = vpack.c.bf16 %v765_v10, %v764_v9  ;;  %v1830_v55 = vpack.c.bf16 %v783_v41, %v782_v40  ;;  %v771_v3 = vld [vmem:[#allocation2 + $0x538] sm:$0xff]  ;;  %v786_v4 = vld [vmem:[#allocation2 + $0x5b0] sm:$0xff] }
 0x133   :  { %v755_v9 = vld [vmem:[#allocation2 + $0x4b8] sm:$0xff]  ;;  %v778_v41 = vld [vmem:[#allocation2 + $0x570] sm:$0xff] }
 0x134   :  { %1737 = vmatpush3.bf16.msra.mxu0 %v1736_v18  ;;  %1769 = vmatpush3.bf16.msra.mxu1 %v1766_v7  ;;  %v574_v7 = vld [vmem:[#allocation2 + $0x478] sm:$0xff]  ;;  %v1215_v18 = vld [vmem:[%s2191_s3 + $0x1] ss:$0 sm:$0xff] }
 0x135   :  { %1739 = vmatprep.subr.bf16.mxu0 %v1738_v19  ;;  %1771 = vmatprep.subr.bf16.mxu1 %v1770_v22  ;;  %v1790_v8 = vpack.c.bf16 %v574_v7, %v573_v5  ;;  %v787_v5 = vld [vmem:[#allocation2 + $0x5b8] sm:$0xff] }
 0x136   :  { %v1838_v10 = vpack.c.bf16 %v787_v5, %v786_v4  ;;  %v956_v5 = vld [vmem:[#allocation5] sm:$0xff] }
 0x138   :  { %1741 = vmatpush3.bf16.msra.mxu0 %v1740_v23  ;;  %1773 = vmatpush3.bf16.msra.mxu1 %v1770_v22 }
 0x139   :  { %1743 = vmatprep.subr.bf16.mxu0 %v1742_v27  ;;  %1775 = vmatprep.subr.bf16.mxu1 %v1774_v33  ;;  %v55_v27 = vld [vmem:[%s2188_s0] sm:$0xff] }
 0x13c   :  { %1745 = vmatpush3.bf16.msra.mxu0 %v1744_v31  ;;  %1777 = vmatpush3.bf16.msra.mxu1 %v1774_v33 }
 0x13d   :  { %1747 = vmatprep.subr.bf16.mxu0 %v1746_v38  ;;  %1779 = vmatprep.subr.bf16.mxu1 %v1778_v42  ;;  %v749_v38 = vld [vmem:[#allocation2 + $0x488] sm:$0xff] }
 0x13e   :  { %v1796_v46 = vpack.c.bf16 %v749_v38, %v748_v36  ;;  %v760_v36 = vld [vmem:[#allocation2 + $0x4e0] sm:$0xff] }
 0x13f   :  { %v792_v38 = vld [vmem:[#allocation2 + $0x5e0] sm:$0xff] }
 0x140   :  { %1749 = vmatpush3.bf16.msra.mxu0 %v1748_v39  ;;  %1781 = vmatpush3.bf16.msra.mxu1 %v1778_v42  ;;  %v767_v39 = vld [vmem:[#allocation2 + $0x518] sm:$0xff] }
 0x141   :  { %1751 = vmatprep.subr.bf16.mxu0 %v1750_v45  ;;  %1783 = vmatprep.subr.bf16.mxu1 %v1782_v54 }
 0x144   :  { %1753 = vmatpush3.bf16.msra.mxu0 %v1752_v52  ;;  %1785 = vmatpush3.bf16.msra.mxu1 %v1782_v54  ;;  %v751_v54 = vld [vmem:[#allocation2 + $0x498] sm:$0xff] }
 0x145   :  { %1755 = vmatprep.subr.bf16.mxu0 %v1754_v57  ;;  %1787 = vmatprep.subr.bf16.mxu1 %v1786_v63  ;;  %v769_v57 = vld [vmem:[#allocation2 + $0x528] sm:$0xff]  ;;  %v1800_v60 = vpack.c.bf16 %v751_v54, %v750_v53  ;;  %v959_v53 = vld [vmem:[#allocation5 + $0x18] sm:$0xff] }
 0x146   :  { %v1802_v62 = vpack.c.bf16 %v769_v57, %v768_v56 }
 0x148   :  { %1757 = vmatpush3.bf16.msra.mxu0 %v1756_v61  ;;  %1789 = vmatpush3.bf16.msra.mxu1 %v1786_v63  ;;  %v752_v63 = vld [vmem:[#allocation2 + $0x4a0] sm:$0xff] }
 0x149   :  { %1759 = vmatprep.subr.bf16.mxu0 %v1758_v2  ;;  %1791 = vmatprep.subr.bf16.mxu1 %v1790_v8  ;;  %v770_v2 = vld [vmem:[#allocation2 + $0x530] sm:$0xff] }
 0x14a   :  { %v1806_v7 = vpack.c.bf16 %v771_v3, %v770_v2 }
 0x14c   :  { %1761 = vmatpush3.bf16.msra.mxu0 %v1760_v6  ;;  %1793 = vmatpush3.bf16.msra.mxu1 %v1790_v8  ;;  %v1804_v6 = vpack.c.bf16 %v753_v0, %v752_v63  ;;  %v754_v8 = vld [vmem:[#allocation2 + $0x4b0] sm:$0xff] }
 0x14d   :  { %1795 = vmatprep.subr.bf16.mxu0 %v1794_v11  ;;  %1827 = vmatprep.subr.bf16.mxu1 %v1826_v14  ;;  %v1808_v11 = vpack.c.bf16 %v755_v9, %v754_v8  ;;  %v961_v8 = vld [vmem:[#allocation5 + $0x28] sm:$0xff]  ;;  %v963_v9 = vld [vmem:[#allocation5 + $0x38] sm:$0xff] }
 0x201   :  { %v1326_v15 = vpop.f32.mrb[4].mxu0 }
 0x202   :  { %v1327_v16 = vpop.f32.mrb[5].mxu0  ;;  %v1531_v17 = vpop.f32.mrb[2].mxu1 }
 0x203   :  { %v1328_v19 = vadd.f32 %v1327_v16, %v1326_v15  ;;  %v499_v20 = vpop.f32.mrb[3].mxu1  ;;  %v756_v15 = vld [vmem:[#allocation2 + $0x4c0] sm:$0xff]  ;;  %v757_v16 = vld [vmem:[#allocation2 + $0x4c8] sm:$0xff] }
 0x205   :  { %v425_v21 = vadd.f32 %v1328_v19, %v1215_v18  ;;  %v1329_v22 = vpop.f32.mrb[6].mxu0  ;;  %v789_v19 = vld [vmem:[#allocation2 + $0x5c8] sm:$0xff] }
 0x206   :  { %v1330_v23 = vpop.f32.mrb[7].mxu0 }
 0x207   :  { %v500_v24 = vadd.f32 %v499_v20, %v425_v21  ;;  %v1331_v25 = vadd.f32 %v1330_v23, %v1329_v22  ;;  %v774_v21 = vld [vmem:[#allocation2 + $0x550] sm:$0xff]  ;;  %v775_v22 = vld [vmem:[#allocation2 + $0x558] sm:$0xff] }
 0x208   :  { %v1814_v23 = vpack.c.bf16 %v775_v22, %v774_v21  ;;  %v962_v21 = vld [vmem:[#allocation5 + $0x30] sm:$0xff]  ;;  %v965_v22 = vld [vmem:[#allocation5 + $0x48] sm:$0xff] }
 0x209   :  { %v508_v28 = vadd.f32 %v500_v24, %v2052_v47  ;;  %v430_v29 = vadd.f32 %v1331_v25, %v1215_v18  ;;  %v766_v47 = vld [vmem:[#allocation2 + $0x510] sm:$0xff]  ;;  %v1812_v18 = vpack.c.bf16 %v757_v16, %v756_v15  ;;  %v759_v25 = vld [vmem:[#allocation2 + $0x4d8] sm:$0xff]  ;;  %v1862_v15 = vpack.c.bf16 %v963_v9, %v961_v8 }
 0x20a   :  { %v1798_v50 = vpack.c.bf16 %v767_v39, %v766_v47  ;;  %v758_v24 = vld [vmem:[#allocation2 + $0x4d0] sm:$0xff]  ;;  %v793_v39 = vld [vmem:[#allocation2 + $0x5e8] sm:$0xff] }
 0x20b   :  { %v2114_v30 = vadd.f32 %v508_v28, %v55_v27  ;;  %v505_v31 = vadd.f32 %v1531_v17, %v430_v29  ;;  %v788_v17 = vld [vmem:[#allocation2 + $0x5c0] sm:$0xff]  ;;  %v790_v27 = vld [vmem:[#allocation2 + $0x5d0] sm:$0xff]  ;;  %v1816_v28 = vpack.c.bf16 %v759_v25, %v758_v24  ;;  %v791_v29 = vld [vmem:[#allocation2 + $0x5d8] sm:$0xff]  ;;  %v1850_v40 = vpack.c.bf16 %v793_v39, %v792_v38 }
 0x20c   :  { %v1842_v20 = vpack.c.bf16 %v789_v19, %v788_v17  ;;  %v975_v38 = vld [vmem:[#allocation5 + $0x98] sm:$0xff]  ;;  %v972_v39 = vld [vmem:[#allocation5 + $0x80] sm:$0xff] }
 0x20d   :  { %v509_v33 = vadd.f32 %v505_v31, %v2057_v48  ;;  %v512_v34 = vmax.f32 %v2114_v30, 0.0  ;;  %v1846_v31 = vpack.c.bf16 %v791_v29, %v790_v27  ;;  %v964_v27 = vld [vmem:[#allocation5 + $0x40] sm:$0xff]  ;;  %v969_v29 = vld [vmem:[#allocation5 + $0x68] sm:$0xff] }
 0x20f   :  { %v2121_v35 = vadd.f32 %v509_v33, %v56_v32  ;;  %647 = vmatprep.mubr.f32.mxu0 %v512_v34  ;;  %v514_v42 = vrot.slane %v512_v34, 7  ;;  %v520_v44 = vrot.slane %v512_v34, 1  ;;  %v776_v32 = vld [vmem:[#allocation2 + $0x560] sm:$0xff]  ;;  %v777_v33 = vld [vmem:[#allocation2 + $0x568] sm:$0xff] }
 0x210   :  { %v1818_v34 = vpack.c.bf16 %v777_v33, %v776_v32 }
 0x211   :  { %v513_v37 = vmax.f32 %v2121_v35, 0.0 }
 0x213   :  { %v515_v43 = vrot.slane %v513_v37, 7  ;;  %v521_v45 = vrot.slane %v513_v37, 1 }
 0x215   :  { %v517_v48 = vsel %vm70_vm1, %v515_v43, %v514_v42  ;;  %v522_v51 = vsel %vm77_vm0, %v520_v44, %v521_v45  ;;  %v523_v52 = vsel %vm77_vm0, %v521_v45, %v520_v44  ;;  %v516_v61 = vsel %vm70_vm1, %v514_v42, %v515_v43  ;;  %v779_v42 = vld [vmem:[#allocation2 + $0x578] sm:$0xff]  ;;  %v762_v44 = vld [vmem:[#allocation2 + $0x4f0] sm:$0xff] }
 0x216   :  { %1223 = vmatmul.mubr.msk.f32.vlgmr.msra.gmra.mrb[8].mxu0 %vm1236_vm2, %v517_v48  ;;  %1564 = vmatprep.mubr.f32.mxu1 %v522_v51  ;;  %v1822_v43 = vpack.c.bf16 %v779_v42, %v778_v41  ;;  %v763_v45 = vld [vmem:[#allocation2 + $0x4f8] sm:$0xff]  ;;  %v977_v41 = vld [vmem:[#allocation5 + $0xa8] sm:$0xff] }
 0x217   :  { %652 = vmatprep.mubr.f32.mxu0 %v513_v37  ;;  %1565 = vmatmul.mubr.msk.f32.vlgmr.msra.gmra.mrb[4].mxu1 %vm1237_vm3, %v523_v52  ;;  %v761_v37 = vld [vmem:[#allocation2 + $0x4e8] sm:$0xff]  ;;  %v795_v48 = vld [vmem:[#allocation2 + $0x5f8] sm:$0xff] }
 0x218   :  { %1797 = vmatpush3.bf16.msra.mxu0 %v1796_v46  ;;  %1829 = vmatpush3.bf16.msra.mxu1 %v1826_v14  ;;  %v1810_v14 = vpack.c.bf16 %v773_v13, %v772_v12  ;;  %v1820_v47 = vpack.c.bf16 %v761_v37, %v760_v36  ;;  %v794_v46 = vld [vmem:[#allocation2 + $0x5f0] sm:$0xff]  ;;  %v957_v52 = vld [vmem:[#allocation5 + $0x8] sm:$0xff]  ;;  %v979_v42 = vld [vmem:[#allocation5 + $0xb8] sm:$0xff] }
 0x219   :  { %1799 = vmatprep.subr.bf16.mxu0 %v1798_v50  ;;  %1831 = vmatprep.subr.bf16.mxu1 %v1830_v55  ;;  %v1824_v50 = vpack.c.bf16 %v763_v45, %v762_v44  ;;  %v1854_v51 = vpack.c.bf16 %v795_v48, %v794_v46  ;;  %v1858_v54 = vpack.c.bf16 %v959_v53, %v957_v52  ;;  %v970_v36 = vld [vmem:[#allocation5 + $0x70] sm:$0xff]  ;;  %v973_v37 = vld [vmem:[#allocation5 + $0x88] sm:$0xff]  ;;  %v976_v45 = vld [vmem:[#allocation5 + $0xa0] sm:$0xff] }
 0x21a   :  { %653 = vmatmul.mubr.f32.gmra.mrb[10].mxu0 %v516_v61  ;;  %v1878_v44 = vpack.c.bf16 %v979_v42, %v977_v41  ;;  %v978_v46 = vld [vmem:[#allocation5 + $0xb0] sm:$0xff]  ;;  %v981_v48 = vld [vmem:[#allocation5 + $0xc8] sm:$0xff]  ;;  %v980_v53 = vld [vmem:[#allocation5 + $0xc0] sm:$0xff] }
 0x21c   :  { %1801 = vmatpush3.bf16.msra.mxu0 %v1800_v60  ;;  %1833 = vmatpush3.bf16.msra.mxu1 %v1830_v55 }
 0x21d   :  { %1803 = vmatprep.subr.bf16.mxu0 %v1802_v62  ;;  %1835 = vmatprep.subr.bf16.mxu1 %v1834_v1 }
 0x220   :  { %1805 = vmatpush3.bf16.msra.mxu0 %v1804_v6  ;;  %1837 = vmatpush3.bf16.msra.mxu1 %v1834_v1 }
 0x221   :  { %1807 = vmatprep.subr.bf16.mxu0 %v1806_v7  ;;  %1839 = vmatprep.subr.bf16.mxu1 %v1838_v10  ;;  %v958_v7 = vld [vmem:[#allocation5 + $0x10] sm:$0xff] }
 0x224   :  { %1809 = vmatpush3.bf16.msra.mxu0 %v1808_v11  ;;  %1841 = vmatpush3.bf16.msra.mxu1 %v1838_v10 }
 0x225   :  { %1811 = vmatprep.subr.bf16.mxu0 %v1810_v14  ;;  %1843 = vmatprep.subr.bf16.mxu1 %v1842_v20  ;;  %v1860_v14 = vpack.c.bf16 %v958_v7, %v956_v5 }
 0x228   :  { %1813 = vmatpush3.bf16.msra.mxu0 %v1812_v18  ;;  %1845 = vmatpush3.bf16.msra.mxu1 %v1842_v20  ;;  %v960_v20 = vld [vmem:[#allocation5 + $0x20] sm:$0xff] }
 0x229   :  { %1815 = vmatprep.subr.bf16.mxu0 %v1814_v23  ;;  %1847 = vmatprep.subr.bf16.mxu1 %v1846_v31  ;;  %v967_v23 = vld [vmem:[#allocation5 + $0x58] sm:$0xff]  ;;  %v1864_v24 = vpack.c.bf16 %v962_v21, %v960_v20  ;;  %v1065_v20 = vld [vmem:[%s2192_s4] sm:$0xff] }
 0x22a   :  { %v1866_v25 = vpack.c.bf16 %v967_v23, %v965_v22  ;;  %v1068_v21 = vld [vmem:[%s2192_s4 + $0x18] sm:$0xff]  ;;  %v1073_v22 = vsub.s32 0, %v2059_v49  ;;  %v1069_v23 = vld [vmem:[%s2194_s6] sm:$0x3] }
 0x22c   :  { %1817 = vmatpush3.bf16.msra.mxu0 %v1816_v28  ;;  %1849 = vmatpush3.bf16.msra.mxu1 %v1846_v31  ;;  %v966_v28 = vld [vmem:[#allocation5 + $0x50] sm:$0xff]  ;;  %v971_v31 = vld [vmem:[#allocation5 + $0x78] sm:$0xff] }
 0x22d   :  { %1819 = vmatprep.subr.bf16.mxu0 %v1818_v34  ;;  %1851 = vmatprep.subr.bf16.mxu1 %v1850_v40  ;;  %v1868_v32 = vpack.c.bf16 %v966_v28, %v964_v27  ;;  %v1870_v33 = vpack.c.bf16 %v971_v31, %v969_v29  ;;  %v968_v34 = vld [vmem:[#allocation5 + $0x60] sm:$0xff] }
 0x22e   :  { %v1872_v26 = vpack.c.bf16 %v970_v36, %v968_v34 }
 0x230   :  { %1821 = vmatpush3.bf16.msra.mxu0 %v1820_v47  ;;  %1853 = vmatpush3.bf16.msra.mxu1 %v1850_v40  ;;  %v1874_v47 = vpack.c.bf16 %v975_v38, %v973_v37  ;;  %v974_v40 = vld [vmem:[#allocation5 + $0x90] sm:$0xff] }
 0x231   :  { %1823 = vmatprep.subr.bf16.mxu0 %v1822_v43  ;;  %1855 = vmatprep.subr.bf16.mxu1 %v1854_v51  ;;  %v1876_v43 = vpack.c.bf16 %v974_v40, %v972_v39 }
 0x234   :  { %1825 = vmatpush3.bf16.msra.mxu0 %v1824_v50  ;;  %1857 = vmatpush3.bf16.msra.mxu1 %v1854_v51  ;;  %v1880_v50 = vpack.c.bf16 %v978_v46, %v976_v45  ;;  %v983_v51 = vld [vmem:[#allocation5 + $0xd8] sm:$0xff] }
 0x235   :  { %1859 = vmatprep.subr.bf16.mxu0 %v1858_v54  ;;  %v1882_v52 = vpack.c.bf16 %v983_v51, %v981_v48  ;;  %v982_v54 = vld [vmem:[#allocation5 + $0xd0] sm:$0xff] }
 0x2e9   :  { %v1382_v55 = vpop.f32.mrb[8].mxu0 }
 0x2ea   :  { %v1383_v56 = vpop.f32.mrb[9].mxu0  ;;  %v1566_v57 = vpop.f32.mrb[4].mxu1 }
 0x2eb   :  { %v1384_v59 = vadd.f32 %v1383_v56, %v1382_v55  ;;  %v724_v60 = vpop.f32.mrb[5].mxu1  ;;  %v1884_v55 = vpack.c.bf16 %v982_v54, %v980_v53  ;;  %v985_v56 = vld [vmem:[#allocation5 + $0xe8] sm:$0xff] }
 0x2ed   :  { %v650_v61 = vadd.f32 %v1384_v59, %v1221_v58  ;;  %v1385_v62 = vpop.f32.mrb[10].mxu0  ;;  %v984_v59 = vld [vmem:[#allocation5 + $0xe0] sm:$0xff] }
 0x2ee   :  { %v1386_v63 = vpop.f32.mrb[11].mxu0 }
 0x2ef   :  { %v725_v0 = vadd.f32 %v724_v60, %v650_v61  ;;  %v1387_v1 = vadd.f32 %v1386_v63, %v1385_v62  ;;  %v986_v60 = vld [vmem:[#allocation5 + $0xf0] sm:$0xff]  ;;  %v1980_v62 = vmov 0.0  }
 0x2f0   :  { %v1888_v61 = vpack.c.bf16 %v986_v60, %v984_v59 }
 0x2f1   :  { %v733_v2 = vmax.f32 %v725_v0, 0.0  ;;  %v655_v3 = vadd.f32 %v1387_v1, %v1221_v58 }
 0x2f3   :  { %v730_v4 = vadd.f32 %v1566_v57, %v655_v3  ;;  %868 = vmatprep.mubr.f32.mxu0 %v733_v2  ;;  %v735_v10 = vrot.slane %v733_v2, 7  ;;  %v741_v11 = vrot.slane %v733_v2, 1  ;;  %v987_v57 = vld [vmem:[#allocation5 + $0xf8] sm:$0xff]  ;;  %v1227_v2 = vld [vmem:[%s2191_s3 + $0x3] ss:$0 sm:$0xff] }
 0x2f4   :  { %v1886_v58 = vpack.c.bf16 %v987_v57, %v985_v56 }
 0x2f5   :  { %v734_v6 = vmax.f32 %v730_v4, 0.0 }
 0x2f7   :  { %v736_v12 = vrot.slane %v734_v6, 7  ;;  %v742_v13 = vrot.slane %v734_v6, 1 }
 0x2f9   :  { %v738_v16 = vsel %vm70_vm1, %v736_v12, %v735_v10  ;;  %v743_v17 = vsel %vm77_vm0, %v741_v11, %v742_v13  ;;  %v744_v18 = vsel %vm77_vm0, %v742_v13, %v741_v11  ;;  %v737_v19 = vsel %vm70_vm1, %v735_v10, %v736_v12 }
 0x2fa   :  { %1229 = vmatmul.mubr.msk.f32.vlgmr.msra.gmra.mrb[12].mxu0 %vm1236_vm2, %v738_v16  ;;  %1599 = vmatprep.mubr.f32.mxu1 %v743_v17 }
 0x2fb   :  { %873 = vmatprep.mubr.f32.mxu0 %v734_v6  ;;  %1600 = vmatmul.mubr.msk.f32.vlgmr.msra.gmra.mrb[6].mxu1 %vm1237_vm3, %v744_v18 }
 0x2fc   :  { %1861 = vmatpush1.bf16.msra.mxu0 %v1860_v14  ;;  %1158 = vmatprep.mubr.f32.mxu1 %v1980_v62 }
 0x2fd   :  { %1863 = vmatprep.subr.bf16.mxu0 %v1862_v15 }
 0x2fe   :  { %874 = vmatmul.mubr.f32.gmra.mrb[14].mxu0 %v737_v19 }
 0x2ff   :  { %1052 = vmatprep.mubr.f32.mxu0 %v1980_v62 }
 0x300   :  { %1865 = vmatpush1.bf16.msra.mxu0 %v1864_v24  ;;  %v1077_v24 = vsub.s32 1, %v2059_v49 }
 0x301   :  { %1867 = vmatprep.subr.bf16.mxu0 %v1866_v25  ;;  %v1074_v25 = vrot.slane %v1069_v23, %v1073_v22 }
 0x302   :  { %v1078_v27 = vrot.slane %v1069_v23, %v1077_v24 }
 0x304   :  { %1869 = vmatpush1.bf16.msra.mxu0 %v1868_v32 }
 0x305   :  { %1871 = vmatprep.subr.bf16.mxu0 %v1870_v33 }
 0x308   :  { %1873 = vmatpush1.bf16.msra.mxu0 %v1872_v26 }
 0x309   :  { %1875 = vmatprep.subr.bf16.mxu0 %v1874_v47 }
 0x30c   :  { %1877 = vmatpush1.bf16.msra.mxu0 %v1876_v43 }
 0x30d   :  { %1879 = vmatprep.subr.bf16.mxu0 %v1878_v44 }
 0x310   :  { %1881 = vmatpush1.bf16.msra.mxu0 %v1880_v50 }
 0x311   :  { %1883 = vmatprep.subr.bf16.mxu0 %v1882_v52 }
 0x314   :  { %1885 = vmatpush1.bf16.msra.mxu0 %v1884_v55 }
 0x315   :  { %1887 = vmatprep.subr.bf16.mxu0 %v1886_v58 }
 0x318   :  { %1889 = vmatpush1.bf16.msra.mxu0 %v1888_v61 }
 0x3cd   :  { %v1438_v63 = vpop.f32.mrb[12].mxu0 }
 0x3ce   :  { %v1439_v0 = vpop.f32.mrb[13].mxu0  ;;  %v1601_v1 = vpop.f32.mrb[6].mxu1 }
 0x3cf   :  { %v1440_v3 = vadd.f32 %v1439_v0, %v1438_v63  ;;  %v945_v4 = vpop.f32.mrb[7].mxu1 }
 0x3d1   :  { %v871_v5 = vadd.f32 %v1440_v3, %v1227_v2  ;;  %v1441_v6 = vpop.f32.mrb[14].mxu0 }
 0x3d2   :  { %v1442_v7 = vpop.f32.mrb[15].mxu0 }
 0x3d3   :  { %v946_v8 = vadd.f32 %v945_v4, %v871_v5  ;;  %v1443_v9 = vadd.f32 %v1442_v7, %v1441_v6 }
 0x3d5   :  { %v954_v10 = vadd.f32 %v946_v8, %v2114_v30  ;;  %v876_v11 = vadd.f32 %v1443_v9, %v1227_v2  ;;  %v1066_v30 = vld [vmem:[%s2192_s4 + $0x8] sm:$0xff] }
 0x3d7   :  { %v951_v12 = vadd.f32 %v1601_v1, %v876_v11  ;;  %1053 = vmatmul.mubr.f32.vlgmr.msra.gmra.mrb[16].mxu0 %v954_v10 }
 0x3d8   :  { %1058 = vmatprep.mubr.f32.mxu0 %v1980_v62 }
 0x3d9   :  { %v955_v13 = vadd.f32 %v951_v12, %v2121_v35  ;;  %v1067_v35 = vld [vmem:[%s2192_s4 + $0x10] sm:$0xff]  ;;  %s1981_s4 = smov [#allocation7]  }
 0x3da   :  { %s1196_s6 = sshll.u32 %s1981_s4, 4  ;;  %s1197_s6 = int_to_ptr.vmem [resolvable:$true] %s1196_s6 }
 0x3db   :  { %1059 = vmatmul.mubr.f32.gmra.mrb[18].mxu0 %v955_v13  ;;  %s1946_s5 = scalar_lea.vmem %s1197_s6, 1024  ;;  %p1951_p3 = scmp.lt.s32.totalorder %s1197_s6, %s1197_s6 }
 0x3dc   :  { %p1947_p2 = scmp.ne.s32.totalorder %s1197_s6, %s1946_s5  ;;  %p1952_p4 = scmp.lt.s32.totalorder %s1946_s5, %s1946_s5 }
 0x3de   :  { %p1953_p5 = por %p1952_p4, %p1951_p3 }
 0x3e0   :  { %p1954_p6 = pnand %p1953_p5, %p1947_p2 }
 0x4aa   :  { %v1054_v14 = vpop.f32.mrb[16].mxu0 }
 0x4ab   :  { %v1056_v15 = vpop.f32.mrb[17].mxu0 }
 0x4ae   :  { %v1060_v16 = vpop.f32.mrb[18].mxu0 }
 0x4af   :  { %v1892_v17 = vpack.c.bf16 %v1060_v16, %v1054_v14  ;;  %v1062_v18 = vpop.f32.mrb[19].mxu0 }
 0x4b0   :  { %v1890_v19 = vpack.c.bf16 %v1062_v18, %v1056_v15 }
 0x4b2   :  { %1891 = vmatprep.subr.bf16.mxu1 %v1890_v19 }
 0x4b3   :  { %1893 = vmatpush1.bf16.msra.mxu1 %v1892_v17 }
 0x4b6   :  { %1232 = vmatmul.mubr.msk.f32.vlgmr.msra.gmra.mrb[8].mxu1 %vm1081_vm4, %v1065_v20 }
 0x4b7   :  { %1164 = vmatprep.mubr.f32.mxu1 %v1980_v62 }
 0x4ba   :  { %1233 = vmatmul.mubr.msk.f32.gmra.mrb[10].mxu1 %vm1081_vm4, %v1066_v30 }
 0x4bb   :  { %1170 = vmatprep.mubr.f32.mxu1 %v1980_v62 }
 0x4be   :  { %1234 = vmatmul.mubr.msk.f32.gmra.mrb[12].mxu1 %vm1081_vm4, %v1067_v35 }
 0x4bf   :  { %1176 = vmatprep.mubr.f32.mxu1 %v1980_v62 }
 0x4c2   :  { %1235 = vmatmul.mubr.msk.f32.gmra.mrb[14].mxu1 %vm1081_vm4, %v1068_v21 }
 0x589   :  { %v1160_v28 = vpop.f32.mrb[8].mxu1 }
 0x58a   :  { %v1161_v29 = vadd.f32 %v1160_v28, %v1074_v25  ;;  %v1162_v31 = vpop.f32.mrb[9].mxu1 }
 0x58b   :  { %v1163_v32 = vadd.f32 %v1162_v31, %v1078_v27 }
 0x58c   :  { %1183 = vst [vmem:[#allocation7] sm:$0xff] %v1161_v29 }
 0x58d   :  { %1184 = vst [vmem:[#allocation7 + $0x8] sm:$0xff] %v1163_v32  ;;  %v1166_v33 = vpop.f32.mrb[10].mxu1 }
 0x58e   :  { %v1167_v34 = vadd.f32 %v1166_v33, %v1074_v25  ;;  %v1168_v36 = vpop.f32.mrb[11].mxu1 }
 0x58f   :  { %v1169_v37 = vadd.f32 %v1168_v36, %v1078_v27 }
 0x590   :  { %1185 = vst [vmem:[#allocation7 + $0x10] sm:$0xff] %v1167_v34 }
 0x591   :  { %1186 = vst [vmem:[#allocation7 + $0x18] sm:$0xff] %v1169_v37  ;;  %v1172_v38 = vpop.f32.mrb[12].mxu1 }
 0x592   :  { %v1173_v26 = vadd.f32 %v1172_v38, %v1074_v25  ;;  %v1174_v47 = vpop.f32.mrb[13].mxu1 }
 0x593   :  { %v1175_v39 = vadd.f32 %v1174_v47, %v1078_v27 }
 0x594   :  { %1187 = vst [vmem:[#allocation7 + $0x20] sm:$0xff] %v1173_v26 }
 0x595   :  { %1188 = vst [vmem:[#allocation7 + $0x28] sm:$0xff] %v1175_v39  ;;  %v1178_v49 = vpop.f32.mrb[14].mxu1 }
 0x596   :  { %v1179_v40 = vadd.f32 %v1178_v49, %v1074_v25  ;;  %v1180_v41 = vpop.f32.mrb[15].mxu1 }
 0x597   :  { %v1181_v42 = vadd.f32 %v1180_v41, %v1078_v27 }
 0x598   :  { %1189 = vst [vmem:[#allocation7 + $0x30] sm:$0xff] %v1179_v40 }
 0x599   :  { %1190 = vst [vmem:[#allocation7 + $0x38] sm:$0xff] %v1181_v42 }
 0x59a   :  { %1957 = shalt.err (!%p1954_p6)
}
 0x59b   :  { %s1958_s30 = scalar_lea.hbm %s2195_s7, 1024 }
 0x59c   :  { %p1959_p7 = scmp.ne.s32.totalorder %s2195_s7, %s1958_s30  ;;  %p1962_p8 = scmp.lt.u32.totalorder %s1958_s30, %s2195_s7 }
 0x59e   :  { %p1964_p9 = pnand %p1962_p8, %p1959_p7 }
 0x5a0   :  { %1967 = shalt.err (!%p1964_p9)
}
 0x5a1   :  { %1202 = dma.vmem_to_hbm [thread:$0]  %s1197_s6, 1024, %s2195_s7, [#allocation4], %s1978_s2, %s1978_s2, %s1979_s25  }
 0x5a2   :  { %1972 = dma.done.wait [#allocation4], 1024  }
 0x5a3   :  { %1973 = vsyncadd [#allocation4], 4294966272 }
 0x5a4   :  { %1206 = vsyncpa [#allocation3], 1 }
 0x5a5   :  { %1207 = vsyncpa [#allocation6], 1 }
 0x5a6   :  { %1208 = vsyncpa [#allocation4], 1 }

</bundles_post_ra>
